<compile_context>
chip_gen: v6e
topology: v6e:2x2x1
jax: 0.10.0
libtpu: 0.0.40
codegen_flags: <defaults>
</compile_context>

<pallas_src>
import jax
import jax.numpy as jnp
from jax.experimental import pallas as pl
from jax.experimental.pallas import tpu as pltpu


NUM_CLASSES = 7        # classes per head (GCNConv(16, 7))
HEAD_PAD = 8           # padded per-head width (contiguous 8-lane segments)
OUT_W = 2 * HEAD_PAD   # fused two-head output width (16)


def _round_up(a, b):
    return (a + b - 1) // b * b


# ---------------------------------------------------------------------------
# Shared: masked per-head log_softmax over a lane-packed (rows, 16) buffer
# [head0: 7 classes + 1 pad | head1: 7 classes + 1 pad].
# ---------------------------------------------------------------------------
def _two_head_log_softmax(z):
    rows, width = z.shape
    col = jax.lax.broadcasted_iota(jnp.int32, (rows, width), 1)
    in_head0 = col < HEAD_PAD
    valid = (col % HEAD_PAD) < NUM_CLASSES
    neg_inf = jnp.float32(-jnp.inf)

    z_masked = jnp.where(valid, z, neg_inf)
    m0 = jnp.max(jnp.where(in_head0, z_masked, neg_inf), axis=-1, keepdims=True)
    m1 = jnp.max(jnp.where(in_head0, neg_inf, z_masked), axis=-1, keepdims=True)
    m = jnp.where(in_head0, m0, m1)
    e = jnp.where(valid, jnp.exp(z - m), 0.0)
    s0 = jnp.sum(jnp.where(in_head0, e, 0.0), axis=-1, keepdims=True)
    s1 = jnp.sum(jnp.where(in_head0, 0.0, e), axis=-1, keepdims=True)
    lse = jnp.where(in_head0, m0 + jnp.log(s0), m1 + jnp.log(s1))
    return jnp.where(valid, z - lse, 0.0)


# ---------------------------------------------------------------------------
# Fused single-call kernel (small graphs: everything resident in VMEM).
# ---------------------------------------------------------------------------
def _gcn_fused_kernel(a_ref, x_ref, w1_ref, b1_ref, w_ref, b_ref, out_ref):
    # Layer 1: h = relu(A @ (x @ W1) + b1). Projections stay f32 (tiny);
    # the big A matmuls run bf16 x bf16 -> f32 on the MXU.
    xw = jnp.dot(x_ref[...], w1_ref[...], preferred_element_type=jnp.float32)
    h = jnp.maximum(
        jnp.dot(a_ref[...], xw.astype(jnp.bfloat16),
                preferred_element_type=jnp.float32) + b1_ref[...], 0.0)

    # Fused heads: z = A @ (h @ [W2 | W3]) + [b2 | b3], single pass over A.
    hw = jnp.dot(h, w_ref[...], preferred_element_type=jnp.float32)
    z = jnp.dot(a_ref[...], hw.astype(jnp.bfloat16),
                preferred_element_type=jnp.float32) + b_ref[...]

    out_ref[...] = _two_head_log_softmax(z)


# ---------------------------------------------------------------------------
# Tiled kernel 1:  h = relu( A_hat @ (x @ W1) + b1 )
# grid = (row_tiles, k_tiles); A tile (TM, TK); x K-tile projected in-kernel.
# ---------------------------------------------------------------------------
def _gcn_layer1_kernel(a_ref, x_ref, w1_ref, b1_ref, h_ref, acc_ref):
    k = pl.program_id(1)

    @pl.when(k == 0)
    def _():
        acc_ref[...] = jnp.zeros_like(acc_ref)

    # Tiny projection of this K-tile (TK x F_in @ F_in x H); cast to bf16 so
    # the big A-tile matmul runs at native MXU rate, accumulate in f32.
    proj = jnp.dot(x_ref[...], w1_ref[...], preferred_element_type=jnp.float32)
    acc_ref[...] += jnp.dot(a_ref[...], proj.astype(jnp.bfloat16),
                            preferred_element_type=jnp.float32)

    @pl.when(k == pl.num_programs(1) - 1)
    def _():
        h_ref[...] = jnp.maximum(acc_ref[...] + b1_ref[...], 0.0)


# ---------------------------------------------------------------------------
# Tiled kernel 2: fused heads.
#   Z = A_hat @ (h @ [W2 | W3]) + [b2 | b3]      (single pass over A_hat)
#   out = per-head masked log_softmax, packed (TM, 2*HEAD_PAD).
# ---------------------------------------------------------------------------
def _gcn_heads_kernel(a_ref, h_ref, w_ref, b_ref, out_ref, acc_ref):
    k = pl.program_id(1)

    @pl.when(k == 0)
    def _():
        acc_ref[...] = jnp.zeros_like(acc_ref)

    zw = jnp.dot(h_ref[...], w_ref[...], preferred_element_type=jnp.float32)
    acc_ref[...] += jnp.dot(a_ref[...], zw.astype(jnp.bfloat16),
                            preferred_element_type=jnp.float32)

    @pl.when(k == pl.num_programs(1) - 1)
    def _():
        z = acc_ref[...] + b_ref[...]                          # (TM, OUT_W) f32
        out_ref[...] = _two_head_log_softmax(z)


# ---------------------------------------------------------------------------
# Wrapper
# ---------------------------------------------------------------------------
def gcn_classification_multi_output(x, a_hat, params, *, fuse_threshold=1024):
    n, f_in = x.shape
    hidden = params["w1"].shape[1]
    f_pad = _round_up(f_in, 8)

    # Padded first-layer weights / bias.
    w1 = jnp.zeros((f_pad, hidden), jnp.float32)
    w1 = w1.at[:f_in, :].set(params["w1"].astype(jnp.float32))
    b1 = params["b1"].reshape(1, hidden).astype(jnp.float32)

    # Fused two-head weights / biases: [W2 | 0 | W3 | 0] -> (hidden, OUT_W).
    w_cat = jnp.zeros((hidden, OUT_W), jnp.float32)
    w_cat = w_cat.at[:, :NUM_CLASSES].set(params["w2"])
    w_cat = w_cat.at[:, HEAD_PAD:HEAD_PAD + NUM_CLASSES].set(params["w3"])
    b_cat = jnp.zeros((1, OUT_W), jnp.float32)
    b_cat = b_cat.at[:, :NUM_CLASSES].set(params["b2"].reshape(1, NUM_CLASSES))
    b_cat = b_cat.at[:, HEAD_PAD:HEAD_PAD + NUM_CLASSES].set(
        params["b3"].reshape(1, NUM_CLASSES))

    if n <= fuse_threshold:
        # ---------------- fully fused single-call path ----------------
        n_pad = _round_up(max(n, 1), 128)
        a_p = jnp.zeros((n_pad, n_pad), jnp.bfloat16)
        a_p = a_p.at[:n, :n].set(a_hat.astype(jnp.bfloat16))
        x_p = jnp.zeros((n_pad, f_pad), jnp.float32).at[:n, :f_in].set(x)

        z = pl.pallas_call(
            _gcn_fused_kernel,
            out_shape=jax.ShapeDtypeStruct((n_pad, OUT_W), jnp.float32),
            compiler_params=pltpu.CompilerParams(
                vmem_limit_bytes=32 * 1024 * 1024),
        )(a_p, x_p, w1, b1, w_cat, b_cat)
    else:
        # ---------------- tiled two-call path (large graphs) ----------------
        tile = min(512, _round_up(max(n, 1), 128))
        n_pad = _round_up(n, tile)
        grid = (n_pad // tile, n_pad // tile)
        gi = grid[0]

        a_p = jnp.zeros((n_pad, n_pad), jnp.bfloat16)
        a_p = a_p.at[:n, :n].set(a_hat.astype(jnp.bfloat16))
        x_p = jnp.zeros((n_pad, f_pad), jnp.float32).at[:n, :f_in].set(x)

        cparams = pltpu.CompilerParams(
            dimension_semantics=("parallel", "arbitrary"),
            vmem_limit_bytes=32 * 1024 * 1024,
        )

        # ---- layer 1 ----
        cost1 = pl.CostEstimate(
            flops=2 * n_pad * n_pad * hidden + 2 * n_pad * f_pad * hidden * gi,
            transcendentals=0,
            bytes_accessed=(2 * n_pad * n_pad + 4 * n_pad * f_pad * gi
                            + 4 * f_pad * hidden + 4 * hidden
                            + 4 * n_pad * hidden),
        )
        h = pl.pallas_call(
            _gcn_layer1_kernel,
            out_shape=jax.ShapeDtypeStruct((n_pad, hidden), jnp.float32),
            grid=grid,
            in_specs=[
                pl.BlockSpec((tile, tile), lambda i, k: (i, k)),      # A tile
                pl.BlockSpec((tile, f_pad), lambda i, k: (k, 0)),     # x K-tile
                pl.BlockSpec((f_pad, hidden), lambda i, k: (0, 0)),   # W1
                pl.BlockSpec((1, hidden), lambda i, k: (0, 0)),       # b1
            ],
            out_specs=pl.BlockSpec((tile, hidden), lambda i, k: (i, 0)),
            scratch_shapes=[pltpu.VMEM((tile, hidden), jnp.float32)],
            compiler_params=cparams,
            cost_estimate=cost1,
        )(a_p, x_p, w1, b1)

        # ---- fused heads ----
        cost2 = pl.CostEstimate(
            flops=2 * n_pad * n_pad * OUT_W + 2 * n_pad * hidden * OUT_W * gi,
            transcendentals=n_pad * (OUT_W + 2),
            bytes_accessed=(2 * n_pad * n_pad + 4 * n_pad * hidden * gi
                            + 4 * hidden * OUT_W + 4 * OUT_W
                            + 4 * n_pad * OUT_W),
        )
        z = pl.pallas_call(
            _gcn_heads_kernel,
            out_shape=jax.ShapeDtypeStruct((n_pad, OUT_W), jnp.float32),
            grid=grid,
            in_specs=[
                pl.BlockSpec((tile, tile), lambda i, k: (i, k)),      # A tile
                pl.BlockSpec((tile, hidden), lambda i, k: (k, 0)),    # h K-tile
                pl.BlockSpec((hidden, OUT_W), lambda i, k: (0, 0)),   # [W2|W3]
                pl.BlockSpec((1, OUT_W), lambda i, k: (0, 0)),        # [b2|b3]
            ],
            out_specs=pl.BlockSpec((tile, OUT_W), lambda i, k: (i, 0)),
            scratch_shapes=[pltpu.VMEM((tile, OUT_W), jnp.float32)],
            compiler_params=cparams,
            cost_estimate=cost2,
        )(a_p, h, w_cat, b_cat)

    out1 = z[:n, :NUM_CLASSES]
    out2 = z[:n, HEAD_PAD:HEAD_PAD + NUM_CLASSES]
    return jnp.stack([out1, out2], axis=0)


# ---------------------------------------------------------------------------
# Graph / parameter helpers (plain JAX glue)
# ---------------------------------------------------------------------------
def build_normalized_adjacency(edge_index, num_nodes):
    """Dense A_hat = D^{-1/2} (A + I) D^{-1/2}, matching PyG gcn_norm."""
    src, dst = edge_index
    a = jnp.zeros((num_nodes, num_nodes), jnp.float32)
    # message flows src -> dst: row = dst (target), col = src (source)
    a = a.at[dst, src].add(1.0)
    a = a + jnp.eye(num_nodes, dtype=jnp.float32)   # add self-loops
    deg = jnp.sum(a, axis=1)
    d_inv_sqrt = jnp.where(deg > 0, 1.0 / jnp.sqrt(deg), 0.0)
    return d_inv_sqrt[:, None] * a * d_inv_sqrt[None, :]


def chain_edge_index(num_nodes):
    s = jnp.arange(num_nodes - 1, dtype=jnp.int32)
    src = jnp.concatenate([s, s + 1])
    dst = jnp.concatenate([s + 1, s])
    return jnp.stack([src, dst], axis=0)


def glorot(key, shape):
    fan_in, fan_out = shape
    limit = jnp.sqrt(6.0 / (fan_in + fan_out))
    return jax.random.uniform(key, shape, jnp.float32, -limit, limit)


def init_params(key):
    k1, k2, k3 = jax.random.split(key, 3)
    return {
        # GCNConv(3, 16)
        "w1": glorot(k1, (3, 16)),
        "b1": jnp.zeros((1, 16), jnp.float32),
        # GCNConv(16, 7)
        "w2": glorot(k2, (16, 7)),
        "b2": jnp.zeros((1, 7), jnp.float32),
        # GCNConv(16, 7) (second head)
        "w3": glorot(k3, (16, 7)),
        "b3": jnp.zeros((1, 7), jnp.float32),
    }


def _reference(x, a_hat, params):
    h = jnp.maximum(a_hat @ (x @ params["w1"]) + params["b1"], 0.0)

    def head(w, b):
        return jax.nn.log_softmax(a_hat @ (h @ w) + b, axis=-1)

    return jnp.stack([head(params["w2"], params["b2"]),
                      head(params["w3"], params["b3"])], axis=0)


if __name__ == "__main__":
    key = jax.random.PRNGKey(0)
    k_x, k_p, k_x2 = jax.random.split(key, 3)
    params = init_params(k_p)

    # ---- small case (matches the torch fixture): 8 nodes, 3 feats, chain ----
    edge_index = jnp.array(
        [[0, 1, 1, 2, 2, 3, 3, 4, 4, 5, 5, 6, 6, 7],
         [1, 0, 2, 1, 3, 2, 4, 3, 5, 4, 6, 5, 7, 6]], dtype=jnp.int32)
    num_nodes = 8
    x = jax.random.normal(k_x, (num_nodes, 3), jnp.float32)
    a_hat = build_normalized_adjacency(edge_index, num_nodes)

    out = gcn_classification_multi_output(x, a_hat, params)   # fused path
    out = jax.block_until_ready(out)

    assert out.shape == (2, num_nodes, 7)
    # Each row of a log_softmax output must exp-sum to ~1.
    assert jnp.allclose(jnp.sum(jnp.exp(out), axis=-1), 1.0, atol=1e-4)
    # f32 reference (bf16 A_hat in the kernel gives ~1e-2-scale error).
    ref = _reference(x, a_hat, params)
    assert jnp.allclose(out, ref, atol=5e-2, rtol=5e-2)

    # ---- larger case: 600-node chain, forces the tiled multi-block path ----
    n_big = 600
    x_big = jax.random.normal(k_x2, (n_big, 3), jnp.float32)
    a_big = build_normalized_adjacency(chain_edge_index(n_big), n_big)

    out_big = gcn_classification_multi_output(
        x_big, a_big, params, fuse_threshold=0)               # tiled path
    out_big = jax.block_until_ready(out_big)

    assert out_big.shape == (2, n_big, 7)
    assert jnp.allclose(jnp.sum(jnp.exp(out_big), axis=-1), 1.0, atol=1e-4)
    ref_big = _reference(x_big, a_big, params)
    assert jnp.allclose(out_big, ref_big, atol=5e-2, rtol=5e-2)

    print("KERNEL_OK")
</pallas_src>

<mosaic_0001>
module attributes {stable_mosaic.version = 11 : i64} {
  func.func @_gcn_fused_kernel(%arg0: memref<128x128xbf16, #tpu.memory_space<vmem>>, %arg1: memref<128x8xf32, #tpu.memory_space<vmem>>, %arg2: memref<8x16xf32, #tpu.memory_space<vmem>>, %arg3: memref<1x16xf32, #tpu.memory_space<vmem>>, %arg4: memref<16x16xf32, #tpu.memory_space<vmem>>, %arg5: memref<1x16xf32, #tpu.memory_space<vmem>>, %arg6: memref<128x16xf32, #tpu.memory_space<vmem>>) attributes {dimension_semantics = [], scalar_prefetch = 0 : i64, scratch_operands = 0 : i64, tpu.core_type = #tpu.core_type<tc>} {
    %c0 = arith.constant 0 : index
    %c0_0 = arith.constant 0 : index
    %0 = vector.load %arg1[%c0, %c0_0] : memref<128x8xf32, #tpu.memory_space<vmem>>, vector<128x8xf32>
    %c0_1 = arith.constant 0 : index
    %c0_2 = arith.constant 0 : index
    %1 = vector.load %arg2[%c0_1, %c0_2] : memref<8x16xf32, #tpu.memory_space<vmem>>, vector<8x16xf32>
    %cst = arith.constant dense<0.000000e+00> : vector<128x16xf32>
    %2 = tpu.matmul %0, %1, %cst {dimension_numbers = #tpu.dot_dimension_numbers<[1], [0], [0], [1], [0, 0, 1, 1], [], []>} : vector<128x8xf32>, vector<8x16xf32>, vector<128x16xf32> -> vector<128x16xf32>
    %c0_3 = arith.constant 0 : index
    %c0_4 = arith.constant 0 : index
    %3 = vector.load %arg0[%c0_3, %c0_4] : memref<128x128xbf16, #tpu.memory_space<vmem>>, vector<128x128xbf16>
    %4 = arith.truncf %2 : vector<128x16xf32> to vector<128x16xbf16>
    %cst_5 = arith.constant dense<0.000000e+00> : vector<128x16xf32>
    %5 = tpu.matmul %3, %4, %cst_5 {dimension_numbers = #tpu.dot_dimension_numbers<[1], [0], [0], [1], [0, 0, 1, 1], [], []>} : vector<128x128xbf16>, vector<128x16xbf16>, vector<128x16xf32> -> vector<128x16xf32>
    %c0_6 = arith.constant 0 : index
    %c0_7 = arith.constant 0 : index
    %6 = vector.load %arg3[%c0_6, %c0_7] : memref<1x16xf32, #tpu.memory_space<vmem>>, vector<1x16xf32>
    %7 = vector.broadcast %6 : vector<1x16xf32> to vector<128x16xf32>
    %8 = arith.addf %5, %7 : vector<128x16xf32>
    %cst_8 = arith.constant 0.000000e+00 : f32
    %9 = vector.broadcast %cst_8 : f32 to vector<128x16xf32>
    %10 = arith.maximumf %8, %9 : vector<128x16xf32>
    %c0_9 = arith.constant 0 : index
    %c0_10 = arith.constant 0 : index
    %11 = vector.load %arg4[%c0_9, %c0_10] : memref<16x16xf32, #tpu.memory_space<vmem>>, vector<16x16xf32>
    %cst_11 = arith.constant dense<0.000000e+00> : vector<128x16xf32>
    %12 = tpu.matmul %10, %11, %cst_11 {dimension_numbers = #tpu.dot_dimension_numbers<[1], [0], [0], [1], [0, 0, 1, 1], [], []>} : vector<128x16xf32>, vector<16x16xf32>, vector<128x16xf32> -> vector<128x16xf32>
    %c0_12 = arith.constant 0 : index
    %c0_13 = arith.constant 0 : index
    %13 = vector.load %arg0[%c0_12, %c0_13] : memref<128x128xbf16, #tpu.memory_space<vmem>>, vector<128x128xbf16>
    %14 = arith.truncf %12 : vector<128x16xf32> to vector<128x16xbf16>
    %cst_14 = arith.constant dense<0.000000e+00> : vector<128x16xf32>
    %15 = tpu.matmul %13, %14, %cst_14 {dimension_numbers = #tpu.dot_dimension_numbers<[1], [0], [0], [1], [0, 0, 1, 1], [], []>} : vector<128x128xbf16>, vector<128x16xbf16>, vector<128x16xf32> -> vector<128x16xf32>
    %c0_15 = arith.constant 0 : index
    %c0_16 = arith.constant 0 : index
    %16 = vector.load %arg5[%c0_15, %c0_16] : memref<1x16xf32, #tpu.memory_space<vmem>>, vector<1x16xf32>
    %17 = vector.broadcast %16 : vector<1x16xf32> to vector<128x16xf32>
    %18 = arith.addf %15, %17 : vector<128x16xf32>
    %19 = tpu.iota {dimensions = array<i32: 1>} : vector<128x16xi32>
    %c8_i32 = arith.constant 8 : i32
    %20 = vector.broadcast %c8_i32 : i32 to vector<128x16xi32>
    %21 = arith.cmpi slt, %19, %20 : vector<128x16xi32>
    %c8_i32_17 = arith.constant 8 : i32
    %c0_i32 = arith.constant 0 : i32
    %22 = arith.cmpi eq, %c8_i32_17, %c0_i32 : i32
    %c1_i32 = arith.constant 1 : i32
    %23 = arith.select %22, %c1_i32, %c8_i32_17 : i32
    %24 = vector.broadcast %23 : i32 to vector<128x16xi32>
    %25 = arith.remsi %19, %24 : vector<128x16xi32>
    %c0_i32_18 = arith.constant 0 : i32
    %26 = vector.broadcast %c0_i32_18 : i32 to vector<128x16xi32>
    %27 = arith.cmpi ne, %25, %26 : vector<128x16xi32>
    %c0_i32_19 = arith.constant 0 : i32
    %28 = vector.broadcast %c0_i32_19 : i32 to vector<128x16xi32>
    %29 = arith.cmpi slt, %25, %28 : vector<128x16xi32>
    %c0_i32_20 = arith.constant 0 : i32
    %30 = arith.cmpi slt, %23, %c0_i32_20 : i32
    %31 = vector.broadcast %30 : i1 to vector<128x16xi1>
    %32 = vector.broadcast %31 : vector<128x16xi1> to vector<128x16xi1>
    %33 = arith.xori %29, %32 : vector<128x16xi1>
    %34 = arith.andi %33, %27 : vector<128x16xi1>
    %35 = vector.broadcast %23 : i32 to vector<128x16xi32>
    %36 = arith.addi %25, %35 : vector<128x16xi32>
    %37 = arith.select %34, %36, %25 : vector<128x16xi1>, vector<128x16xi32>
    %c7_i32 = arith.constant 7 : i32
    %38 = vector.broadcast %c7_i32 : i32 to vector<128x16xi32>
    %39 = arith.cmpi slt, %37, %38 : vector<128x16xi32>
    %cst_21 = arith.constant 0xFF800000 : f32
    %40 = vector.broadcast %cst_21 : f32 to vector<128x16xf32>
    %41 = arith.select %39, %18, %40 : vector<128x16xi1>, vector<128x16xf32>
    %cst_22 = arith.constant 0xFF800000 : f32
    %42 = vector.broadcast %cst_22 : f32 to vector<128x16xf32>
    %43 = arith.select %21, %41, %42 : vector<128x16xi1>, vector<128x16xf32>
    %cst_23 = arith.constant dense<0xFF800000> : vector<128xf32>
    %44 = vector.multi_reduction <maximumf>, %43, %cst_23 [1] : vector<128x16xf32> to vector<128xf32>
    %45 = vector.shape_cast %44 : vector<128xf32> to vector<128x1xf32>
    %cst_24 = arith.constant 0xFF800000 : f32
    %46 = vector.broadcast %cst_24 : f32 to vector<128x16xf32>
    %47 = arith.select %21, %46, %41 : vector<128x16xi1>, vector<128x16xf32>
    %cst_25 = arith.constant dense<0xFF800000> : vector<128xf32>
    %48 = vector.multi_reduction <maximumf>, %47, %cst_25 [1] : vector<128x16xf32> to vector<128xf32>
    %49 = vector.shape_cast %48 : vector<128xf32> to vector<128x1xf32>
    %50 = vector.shape_cast %45 : vector<128x1xf32> to vector<128x1xf32>
    %51 = vector.broadcast %50 : vector<128x1xf32> to vector<128x16xf32>
    %52 = vector.shape_cast %49 : vector<128x1xf32> to vector<128x1xf32>
    %53 = vector.broadcast %52 : vector<128x1xf32> to vector<128x16xf32>
    %54 = arith.select %21, %51, %53 : vector<128x16xi1>, vector<128x16xf32>
    %55 = arith.subf %18, %54 : vector<128x16xf32>
    %56 = math.exp %55 : vector<128x16xf32>
    %cst_26 = arith.constant 0.000000e+00 : f32
    %57 = vector.broadcast %cst_26 : f32 to vector<128x16xf32>
    %58 = arith.select %39, %56, %57 : vector<128x16xi1>, vector<128x16xf32>
    %cst_27 = arith.constant 0.000000e+00 : f32
    %59 = vector.broadcast %cst_27 : f32 to vector<128x16xf32>
    %60 = arith.select %21, %58, %59 : vector<128x16xi1>, vector<128x16xf32>
    %cst_28 = arith.constant dense<0.000000e+00> : vector<128xf32>
    %61 = vector.multi_reduction <add>, %60, %cst_28 [1] : vector<128x16xf32> to vector<128xf32>
    %62 = vector.shape_cast %61 : vector<128xf32> to vector<128x1xf32>
    %cst_29 = arith.constant 0.000000e+00 : f32
    %63 = vector.broadcast %cst_29 : f32 to vector<128x16xf32>
    %64 = arith.select %21, %63, %58 : vector<128x16xi1>, vector<128x16xf32>
    %cst_30 = arith.constant dense<0.000000e+00> : vector<128xf32>
    %65 = vector.multi_reduction <add>, %64, %cst_30 [1] : vector<128x16xf32> to vector<128xf32>
    %66 = vector.shape_cast %65 : vector<128xf32> to vector<128x1xf32>
    %67 = math.log %62 : vector<128x1xf32>
    %68 = arith.addf %45, %67 : vector<128x1xf32>
    %69 = math.log %66 : vector<128x1xf32>
    %70 = arith.addf %49, %69 : vector<128x1xf32>
    %71 = vector.shape_cast %68 : vector<128x1xf32> to vector<128x1xf32>
    %72 = vector.broadcast %71 : vector<128x1xf32> to vector<128x16xf32>
    %73 = vector.shape_cast %70 : vector<128x1xf32> to vector<128x1xf32>
    %74 = vector.broadcast %73 : vector<128x1xf32> to vector<128x16xf32>
    %75 = arith.select %21, %72, %74 : vector<128x16xi1>, vector<128x16xf32>
    %76 = arith.subf %18, %75 : vector<128x16xf32>
    %cst_31 = arith.constant 0.000000e+00 : f32
    %77 = vector.broadcast %cst_31 : f32 to vector<128x16xf32>
    %78 = arith.select %39, %76, %77 : vector<128x16xi1>, vector<128x16xf32>
    %c0_32 = arith.constant 0 : index
    %c0_33 = arith.constant 0 : index
    %79 = vector.load %arg6[%c0_32, %c0_33] : memref<128x16xf32, #tpu.memory_space<vmem>>, vector<128x16xf32>
    tpu.vector_store %arg6[%c0_32, %c0_33], %78 {strides = array<i32>} : memref<128x16xf32, #tpu.memory_space<vmem>>, vector<128x16xf32>,
    return
  }
}

</mosaic_0001>

<bundles_post_ra>
// kernel: tpu_custom_call.1
= control target key start
LH: loop header
LB: loop body
LE: loop exit
PB: predicated region body
PF: predicated region fallthrough
CT: control target
= control target key end

     0   :  { %vm41_vm0 = vcmask 64512   ;;  %vm429_vm1 = vcmask 130048   ;;  %s2446_s2 = inlined_call_operand.vmem [shape: f32[8,16], index: 2, kind: input, shape index: {}]   ;;  %s2447_s1 = inlined_call_operand.vmem [shape: f32[128,8], index: 1, kind: input, shape index: {}]   ;;  %s2448_s0 = inlined_call_operand.vmem [shape: bf16[128,128], index: 0, kind: input, shape index: {}]   ;;  %s2449_s4 = inlined_call_operand.vmem [shape: f32[16,16], index: 4, kind: input, shape index: {}]   ;;  %s2450_s3 = inlined_call_operand.vmem [shape: f32[1,16], index: 3, kind: input, shape index: {}]   ;;  %s2451_s5 = inlined_call_operand.vmem [shape: f32[1,16], index: 5, kind: input, shape index: {}]   ;;  %s2452_s6 = inlined_call_operand.vmem [shape: f32[128,16], index: 6, kind: output, shape index: {}]  }
   0x1   :  { %v40_v0 = vld [vmem:[%s2446_s2] sm:$0xff]  ;;  %v25_v2 = vld [vmem:[%s2447_s1 + $0x8] sm:$0xff]  ;;  %v26_v3 = vld [vmem:[%s2447_s1 + $0x10] sm:$0xff] }
   0x2   :  { %v24_v1 = vld [vmem:[%s2447_s1] sm:$0xff]  ;;  %1376 = vmatprep.subr.mxu0 %v40_v0  ;;  %v27_v4 = vld [vmem:[%s2447_s1 + $0x18] sm:$0xff]  ;;  %v29_v6 = vld [vmem:[%s2447_s1 + $0x28] sm:$0xff] }
   0x3   :  { %1378 = vmatprep.mubr.msk.f32.mxu0 %vm41_vm0, %v24_v1  ;;  %1377 = vmatpush3.msra.mxu0 %v40_v0  ;;  %v28_v5 = vld [vmem:[%s2447_s1 + $0x20] sm:$0xff]  ;;  %v30_v7 = vld [vmem:[%s2447_s1 + $0x30] sm:$0xff]  ;;  %v31_v8 = vld [vmem:[%s2447_s1 + $0x38] sm:$0xff] }
   0x4   :  { %1379 = vmatmul.mubr.msk.f32.vlgmr.msra.gmra.mxu0 %vm41_vm0, %v25_v2  ;;  %v32_v9 = vld [vmem:[%s2447_s1 + $0x40] sm:$0xff]  ;;  %v33_v10 = vld [vmem:[%s2447_s1 + $0x48] sm:$0xff]  ;;  %v34_v11 = vld [vmem:[%s2447_s1 + $0x50] sm:$0xff] }
   0x5   :  { %1381 = vmatprep.mubr.msk.f32.mxu0 %vm41_vm0, %v26_v3  ;;  %v35_v12 = vld [vmem:[%s2447_s1 + $0x58] sm:$0xff]  ;;  %v36_v13 = vld [vmem:[%s2447_s1 + $0x60] sm:$0xff]  ;;  %v37_v14 = vld [vmem:[%s2447_s1 + $0x68] sm:$0xff] }
   0x6   :  { %v38_v15 = vld [vmem:[%s2447_s1 + $0x70] sm:$0xff]  ;;  %v39_v16 = vld [vmem:[%s2447_s1 + $0x78] sm:$0xff]  ;;  %v1719_v17 = vld [vmem:[%s2448_s0] sm:$0xff]  }
   0x7   :  { %1418 = vmatprep.mubr.bf16.mxu1 %v1719_v17  ;;  %v428_v18 = vld [vmem:[%s2449_s4 + $0x8] sm:$0xff]  ;;  %v427_v19 = vld [vmem:[%s2449_s4] sm:$0xff]  ;;  %v1512_v45 = vld [vmem:[%s2448_s0 + $0x10] sm:$0xff]  }
   0x8   :  { %1382 = vmatmul.mubr.msk.f32.gmra.mxu0 %vm41_vm0, %v27_v4  ;;  %1434 = vmatprep.subr.mxu0 %v428_v18  ;;  %v1731_v44 = vld [vmem:[%s2448_s0 + $0x8] sm:$0xff]   ;;  %v1740_v46 = vld [vmem:[%s2448_s0 + $0x18] sm:$0xff]   ;;  %v1745_v47 = vld [vmem:[%s2448_s0 + $0x20] sm:$0xff]  }
   0x9   :  { %1384 = vmatprep.mubr.msk.f32.mxu0 %vm41_vm0, %v28_v5  ;;  %1435 = vmatpush3.msra.mxu0 %v428_v18  ;;  %v1752_v48 = vld [vmem:[%s2448_s0 + $0x28] sm:$0xff]   ;;  %v1757_v49 = vld [vmem:[%s2448_s0 + $0x30] sm:$0xff]   ;;  %v1764_v50 = vld [vmem:[%s2448_s0 + $0x38] sm:$0xff]  }
   0xa   :  { %1436 = vmatprep.subr.mxu0 %v427_v19  ;;  %v1283_v52 = vld [vmem:[%s2450_s3] ss:$0 sm:$0xff] }
   0xb   :  { %1437 = vmatpush3.msra.mxu0 %v427_v19 }
   0xc   :  { %1385 = vmatmul.mubr.msk.f32.gmra.mxu0 %vm41_vm0, %v29_v6 }
   0xd   :  { %1387 = vmatprep.mubr.msk.f32.mxu0 %vm41_vm0, %v30_v7 }
  0x10   :  { %1388 = vmatmul.mubr.msk.f32.gmra.mxu0 %vm41_vm0, %v31_v8 }
  0x11   :  { %1390 = vmatprep.mubr.msk.f32.mxu0 %vm41_vm0, %v32_v9 }
  0x14   :  { %1391 = vmatmul.mubr.msk.f32.gmra.mxu0 %vm41_vm0, %v33_v10 }
  0x15   :  { %1393 = vmatprep.mubr.msk.f32.mxu0 %vm41_vm0, %v34_v11 }
  0x18   :  { %1394 = vmatmul.mubr.msk.f32.gmra.mxu0 %vm41_vm0, %v35_v12 }
  0x19   :  { %1396 = vmatprep.mubr.msk.f32.mxu0 %vm41_vm0, %v36_v13 }
  0x1c   :  { %1397 = vmatmul.mubr.msk.f32.gmra.mxu0 %vm41_vm0, %v37_v14 }
  0x1d   :  { %1399 = vmatprep.mubr.msk.f32.mxu0 %vm41_vm0, %v38_v15 }
  0x20   :  { %1400 = vmatmul.mubr.msk.f32.gmra.mxu0 %vm41_vm0, %v39_v16 }
  0xc4   :  { %v1380_v20 = vpop.f32.mrf.mxu0 }
  0xc6   :  { %v156_v21 = vpop.f32.mrf.mxu0 }
  0xc7   :  { %v251_v43 = vpack.c.bf16 %v1380_v20, %v156_v21 }
  0xc8   :  { %v1383_v22 = vpop.f32.mrf.mxu0 }
  0xca   :  { %v166_v23 = vpop.f32.mrf.mxu0 }
  0xcb   :  { %v252_v42 = vpack.c.bf16 %v1383_v22, %v166_v23 }
  0xcc   :  { %v1386_v24 = vpop.f32.mrf.mxu0 }
  0xce   :  { %v176_v25 = vpop.f32.mrf.mxu0 }
  0xcf   :  { %v253_v41 = vpack.c.bf16 %v1386_v24, %v176_v25 }
  0xd0   :  { %v1389_v26 = vpop.f32.mrf.mxu0 }
  0xd2   :  { %v186_v27 = vpop.f32.mrf.mxu0 }
  0xd3   :  { %v254_v40 = vpack.c.bf16 %v1389_v26, %v186_v27 }
  0xd4   :  { %v1392_v28 = vpop.f32.mrf.mxu0 }
  0xd6   :  { %v196_v29 = vpop.f32.mrf.mxu0 }
  0xd7   :  { %v255_v39 = vpack.c.bf16 %v1392_v28, %v196_v29 }
  0xd8   :  { %v1395_v30 = vpop.f32.mrf.mxu0 }
  0xda   :  { %v206_v31 = vpop.f32.mrf.mxu0 }
  0xdb   :  { %v256_v38 = vpack.c.bf16 %v1395_v30, %v206_v31 }
  0xdc   :  { %v1398_v32 = vpop.f32.mrf.mxu0 }
  0xde   :  { %v216_v33 = vpop.f32.mrf.mxu0 }
  0xdf   :  { %v257_v37 = vpack.c.bf16 %v1398_v32, %v216_v33 }
  0xe0   :  { %v1401_v34 = vpop.f32.mrf.mxu0 }
  0xe2   :  { %v226_v35 = vpop.f32.mrf.mxu0 }
  0xe3   :  { %v258_v36 = vpack.c.bf16 %v1401_v34, %v226_v35 }
  0xe5   :  { %1402 = vmatprep.subr.bf16.mxu1 %v258_v36 }
  0xe6   :  { %1403 = vmatpush3.bf16.msra.mxu1 %v258_v36 }
  0xe7   :  { %1404 = vmatprep.subr.bf16.mxu1 %v257_v37 }
  0xea   :  { %1405 = vmatpush3.bf16.msra.mxu1 %v257_v37 }
  0xeb   :  { %1406 = vmatprep.subr.bf16.mxu1 %v256_v38 }
  0xee   :  { %1407 = vmatpush3.bf16.msra.mxu1 %v256_v38 }
  0xef   :  { %1408 = vmatprep.subr.bf16.mxu1 %v255_v39 }
  0xf2   :  { %1409 = vmatpush3.bf16.msra.mxu1 %v255_v39 }
  0xf3   :  { %1410 = vmatprep.subr.bf16.mxu1 %v254_v40 }
  0xf6   :  { %1411 = vmatpush3.bf16.msra.mxu1 %v254_v40 }
  0xf7   :  { %1412 = vmatprep.subr.bf16.mxu1 %v253_v41 }
  0xfa   :  { %1413 = vmatpush3.bf16.msra.mxu1 %v253_v41 }
  0xfb   :  { %1414 = vmatprep.subr.bf16.mxu1 %v252_v42 }
  0xfe   :  { %1415 = vmatpush3.bf16.msra.mxu1 %v252_v42 }
  0xff   :  { %1416 = vmatprep.subr.bf16.mxu1 %v251_v43 }
 0x102   :  { %1417 = vmatpush3.bf16.msra.mxu1 %v251_v43 }
 0x105   :  { %1419 = vmatmul.mubr.bf16.vlgmr.msra.gmra.mxu1 %v1731_v44 }
 0x106   :  { %1422 = vmatprep.mubr.bf16.mxu1 %v1512_v45 }
 0x10d   :  { %1423 = vmatmul.mubr.bf16.gmra.mxu1 %v1740_v46 }
 0x10e   :  { %1426 = vmatprep.mubr.bf16.mxu1 %v1745_v47 }
 0x115   :  { %1427 = vmatmul.mubr.bf16.gmra.mxu1 %v1752_v48 }
 0x116   :  { %1430 = vmatprep.mubr.bf16.mxu1 %v1757_v49 }
 0x11d   :  { %1431 = vmatmul.mubr.bf16.gmra.mxu1 %v1764_v50 }
 0x11e   :  { %1482 = vmatprep.mubr.bf16.mxu1 %v1512_v45 }
 0x1c5   :  { %v1420_v51 = vpop.f32.mrf.mxu1 }
 0x1c6   :  { %v357_v57 = vadd.f32 %v1420_v51, %v1283_v52 }
 0x1c7   :  { %v348_v53 = vpop.f32.mrf.mxu1 }
 0x1c8   :  { %v349_v54 = vadd.f32 %v1283_v52, %v348_v53  ;;  %v413_v63 = vmax.f32 %v357_v57, 0.0 }
 0x1c9   :  { %v1421_v55 = vpop.f32.mrf.mxu1 }
 0x1ca   :  { %v411_v56 = vmax.f32 %v349_v54, 0.0  ;;  %v360_v61 = vadd.f32 %v1421_v55, %v1283_v52 }
 0x1cb   :  { %v351_v58 = vpop.f32.mrf.mxu1 }
 0x1cc   :  { %v352_v59 = vadd.f32 %v1283_v52, %v351_v58  ;;  %1438 = vmatprep.mubr.msk.f32.mxu0 %vm429_vm1, %v411_v56  ;;  %v414_v3 = vmax.f32 %v360_v61, 0.0 }
 0x1cd   :  { %v1424_v60 = vpop.f32.mrf.mxu1 }
 0x1ce   :  { %v412_v62 = vmax.f32 %v352_v59, 0.0  ;;  %v373_v5 = vadd.f32 %v1424_v60, %v1283_v52 }
 0x1cf   :  { %v364_v0 = vpop.f32.mrf.mxu1 }
 0x1d0   :  { %v365_v1 = vadd.f32 %v1283_v52, %v364_v0  ;;  %1439 = vmatmul.mubr.msk.f32.vlgmr.msra.gmra.mxu0 %vm429_vm1, %v412_v62  ;;  %v417_v11 = vmax.f32 %v373_v5, 0.0  ;;  %v1799_v5 = vld [vmem:[%s2451_s5] ss:$0 sm:$0xff] }
 0x1d1   :  { %v1425_v2 = vpop.f32.mrf.mxu1  ;;  %1441 = vmatprep.mubr.msk.f32.mxu0 %vm429_vm1, %v413_v63 }
 0x1d2   :  { %v415_v4 = vmax.f32 %v365_v1, 0.0  ;;  %v376_v9 = vadd.f32 %v1425_v2, %v1283_v52  ;;  %v735_v2 = vlaneseq }
 0x1d3   :  { %v367_v6 = vpop.f32.mrf.mxu1 }
 0x1d4   :  { %v368_v7 = vadd.f32 %v1283_v52, %v367_v6  ;;  %1442 = vmatmul.mubr.msk.f32.gmra.mxu0 %vm429_vm1, %v414_v3  ;;  %v418_v15 = vmax.f32 %v376_v9, 0.0  ;;  %v1793_v3 = vand.u32 127, %v735_v2 }
 0x1d5   :  { %v1428_v8 = vpop.f32.mrf.mxu1  ;;  %1444 = vmatprep.mubr.msk.f32.mxu0 %vm429_vm1, %v415_v4 }
 0x1d6   :  { %v416_v10 = vmax.f32 %v368_v7, 0.0  ;;  %v389_v18 = vadd.f32 %v1428_v8, %v1283_v52  ;;  %v742_v4 = vand.u32 7, %v1793_v3  ;;  %vm737_vm3 = vcmp.lt.s32.totalorder %v1793_v3, 8 }
 0x1d7   :  { %v380_v12 = vpop.f32.mrf.mxu1 }
 0x1d8   :  { %v381_v13 = vadd.f32 %v1283_v52, %v380_v12  ;;  %1445 = vmatmul.mubr.msk.f32.gmra.mxu0 %vm429_vm1, %v416_v10  ;;  %v421_v24 = vmax.f32 %v389_v18, 0.0  ;;  %vm1801_vm2 = vcmp.lt.s32.totalorder %v742_v4, 7 }
 0x1d9   :  { %v1429_v14 = vpop.f32.mrf.mxu1  ;;  %1447 = vmatprep.mubr.msk.f32.mxu0 %vm429_vm1, %v417_v11 }
 0x1da   :  { %v419_v16 = vmax.f32 %v381_v13, 0.0  ;;  %v392_v22 = vadd.f32 %v1429_v14, %v1283_v52 }
 0x1db   :  { %v383_v19 = vpop.f32.mrf.mxu1 }
 0x1dc   :  { %v384_v20 = vadd.f32 %v1283_v52, %v383_v19  ;;  %1448 = vmatmul.mubr.msk.f32.gmra.mxu0 %vm429_vm1, %v418_v15  ;;  %v422_v28 = vmax.f32 %v392_v22, 0.0 }
 0x1dd   :  { %v1432_v21 = vpop.f32.mrf.mxu1  ;;  %1450 = vmatprep.mubr.msk.f32.mxu0 %vm429_vm1, %v419_v16 }
 0x1de   :  { %v420_v23 = vmax.f32 %v384_v20, 0.0  ;;  %v405_v30 = vadd.f32 %v1432_v21, %v1283_v52 }
 0x1df   :  { %v396_v25 = vpop.f32.mrf.mxu1 }
 0x1e0   :  { %v397_v26 = vadd.f32 %v1283_v52, %v396_v25  ;;  %1451 = vmatmul.mubr.msk.f32.gmra.mxu0 %vm429_vm1, %v420_v23  ;;  %v425_v35 = vmax.f32 %v405_v30, 0.0 }
 0x1e1   :  { %v1433_v27 = vpop.f32.mrf.mxu1  ;;  %1453 = vmatprep.mubr.msk.f32.mxu0 %vm429_vm1, %v421_v24 }
 0x1e2   :  { %v423_v29 = vmax.f32 %v397_v26, 0.0  ;;  %v408_v33 = vadd.f32 %v1433_v27, %v1283_v52 }
 0x1e3   :  { %v399_v31 = vpop.f32.mrf.mxu1 }
 0x1e4   :  { %v400_v32 = vadd.f32 %v1283_v52, %v399_v31  ;;  %1454 = vmatmul.mubr.msk.f32.gmra.mxu0 %vm429_vm1, %v422_v28  ;;  %v426_v36 = vmax.f32 %v408_v33, 0.0 }
 0x1e5   :  { %1456 = vmatprep.mubr.msk.f32.mxu0 %vm429_vm1, %v423_v29 }
 0x1e6   :  { %v424_v34 = vmax.f32 %v400_v32, 0.0 }
 0x1e8   :  { %1457 = vmatmul.mubr.msk.f32.gmra.mxu0 %vm429_vm1, %v424_v34 }
 0x1e9   :  { %1459 = vmatprep.mubr.msk.f32.mxu0 %vm429_vm1, %v425_v35 }
 0x1ec   :  { %1460 = vmatmul.mubr.msk.f32.gmra.mxu0 %vm429_vm1, %v426_v36 }
 0x1ed   :  { %1478 = vmatprep.mubr.bf16.mxu0 %v1719_v17 }
 0x290   :  { %v1440_v37 = vpop.f32.mrf.mxu0 }
 0x292   :  { %v544_v38 = vpop.f32.mrf.mxu0 }
 0x293   :  { %v623_v1 = vpack.c.bf16 %v1440_v37, %v544_v38 }
 0x294   :  { %v1443_v39 = vpop.f32.mrf.mxu0 }
 0x296   :  { %v554_v40 = vpop.f32.mrf.mxu0 }
 0x297   :  { %v624_v0 = vpack.c.bf16 %v1443_v39, %v554_v40 }
 0x298   :  { %v1446_v41 = vpop.f32.mrf.mxu0 }
 0x29a   :  { %v564_v42 = vpop.f32.mrf.mxu0 }
 0x29b   :  { %v625_v63 = vpack.c.bf16 %v1446_v41, %v564_v42 }
 0x29c   :  { %v1449_v43 = vpop.f32.mrf.mxu0 }
 0x29e   :  { %v574_v45 = vpop.f32.mrf.mxu0 }
 0x29f   :  { %v626_v62 = vpack.c.bf16 %v1449_v43, %v574_v45 }
 0x2a0   :  { %v1452_v51 = vpop.f32.mrf.mxu0 }
 0x2a2   :  { %v584_v52 = vpop.f32.mrf.mxu0 }
 0x2a3   :  { %v627_v61 = vpack.c.bf16 %v1452_v51, %v584_v52 }
 0x2a4   :  { %v1455_v53 = vpop.f32.mrf.mxu0 }
 0x2a6   :  { %v594_v54 = vpop.f32.mrf.mxu0 }
 0x2a7   :  { %v628_v17 = vpack.c.bf16 %v1455_v53, %v594_v54 }
 0x2a8   :  { %v1458_v55 = vpop.f32.mrf.mxu0 }
 0x2aa   :  { %v604_v56 = vpop.f32.mrf.mxu0 }
 0x2ab   :  { %v629_v60 = vpack.c.bf16 %v1458_v55, %v604_v56 }
 0x2ac   :  { %v1461_v57 = vpop.f32.mrf.mxu0 }
 0x2ae   :  { %v614_v58 = vpop.f32.mrf.mxu0 }
 0x2af   :  { %v630_v59 = vpack.c.bf16 %v1461_v57, %v614_v58 }
 0x2b1   :  { %1462 = vmatprep.subr.bf16.mxu0 %v630_v59  ;;  %1494 = vmatprep.subr.bf16.mxu1 %v630_v59 }
 0x2b2   :  { %1463 = vmatpush3.bf16.msra.mxu0 %v630_v59  ;;  %1502 = vmatpush3.bf16.msra.mxu1 %v630_v59 }
 0x2b3   :  { %1464 = vmatprep.subr.bf16.mxu0 %v629_v60  ;;  %1495 = vmatprep.subr.bf16.mxu1 %v629_v60 }
 0x2b6   :  { %1465 = vmatpush3.bf16.msra.mxu0 %v629_v60  ;;  %1503 = vmatpush3.bf16.msra.mxu1 %v629_v60 }
 0x2b7   :  { %1466 = vmatprep.subr.bf16.mxu0 %v628_v17  ;;  %1496 = vmatprep.subr.bf16.mxu1 %v628_v17 }
 0x2ba   :  { %1467 = vmatpush3.bf16.msra.mxu0 %v628_v17  ;;  %1504 = vmatpush3.bf16.msra.mxu1 %v628_v17 }
 0x2bb   :  { %1468 = vmatprep.subr.bf16.mxu0 %v627_v61  ;;  %1497 = vmatprep.subr.bf16.mxu1 %v627_v61 }
 0x2be   :  { %1469 = vmatpush3.bf16.msra.mxu0 %v627_v61  ;;  %1505 = vmatpush3.bf16.msra.mxu1 %v627_v61 }
 0x2bf   :  { %1470 = vmatprep.subr.bf16.mxu0 %v626_v62  ;;  %1498 = vmatprep.subr.bf16.mxu1 %v626_v62 }
 0x2c2   :  { %1471 = vmatpush3.bf16.msra.mxu0 %v626_v62  ;;  %1506 = vmatpush3.bf16.msra.mxu1 %v626_v62 }
 0x2c3   :  { %1472 = vmatprep.subr.bf16.mxu0 %v625_v63  ;;  %1499 = vmatprep.subr.bf16.mxu1 %v625_v63 }
 0x2c6   :  { %1473 = vmatpush3.bf16.msra.mxu0 %v625_v63  ;;  %1507 = vmatpush3.bf16.msra.mxu1 %v625_v63 }
 0x2c7   :  { %1474 = vmatprep.subr.bf16.mxu0 %v624_v0  ;;  %1500 = vmatprep.subr.bf16.mxu1 %v624_v0 }
 0x2ca   :  { %1475 = vmatpush3.bf16.msra.mxu0 %v624_v0  ;;  %1508 = vmatpush3.bf16.msra.mxu1 %v624_v0 }
 0x2cb   :  { %1476 = vmatprep.subr.bf16.mxu0 %v623_v1  ;;  %1501 = vmatprep.subr.bf16.mxu1 %v623_v1 }
 0x2ce   :  { %1477 = vmatpush3.bf16.msra.mxu0 %v623_v1  ;;  %1509 = vmatpush3.bf16.msra.mxu1 %v623_v1 }
 0x2d1   :  { %1479 = vmatmul.mubr.bf16.vlgmr.msra.gmra.mxu0 %v1731_v44  ;;  %1483 = vmatmul.mubr.bf16.vlgmr.msra.gmra.mxu1 %v1740_v46 }
 0x2d2   :  { %1486 = vmatprep.mubr.bf16.mxu1 %v1745_v47 }
 0x2d9   :  { %1487 = vmatmul.mubr.bf16.gmra.mxu1 %v1752_v48 }
 0x2da   :  { %1490 = vmatprep.mubr.bf16.mxu1 %v1757_v49 }
 0x2e1   :  { %1491 = vmatmul.mubr.bf16.gmra.mxu1 %v1764_v50 }
 0x391   :  { %v1480_v44 = vpop.f32.mrf.mxu0  ;;  %v1484_v46 = vpop.f32.mrf.mxu1 }
 0x392   :  { %v1806_v48 = vadd.f32 %v1480_v44, %v1799_v5  ;;  %v1809_v49 = vadd.f32 %v1484_v46, %v1799_v5 }
 0x393   :  { %v672_v50 = vpop.f32.mrf.mxu0  ;;  %v688_v6 = vpop.f32.mrf.mxu1 }
 0x394   :  { %v757_v7 = vsel %vm1801_vm2, %v1809_v49, -inf  ;;  %v753_v8 = vsel %vm1801_vm2, %v1806_v48, -inf  ;;  %v1833_v19 = vadd.f32 %v1799_v5, %v672_v50  ;;  %v1850_v27 = vadd.f32 %v1799_v5, %v688_v6 }
 0x395   :  { %v1481_v9 = vpop.f32.mrf.mxu0  ;;  %v1485_v10 = vpop.f32.mrf.mxu1  ;;  %v773_v11 = vsel %vm737_vm3, %v757_v7, -inf  ;;  %v769_v12 = vsel %vm737_vm3, %v753_v8, -inf  ;;  %v833_v18 = vsel %vm737_vm3, -inf, %v753_v8  ;;  %v837_v25 = vsel %vm737_vm3, -inf, %v757_v7 }
 0x396   :  { %v1823_v13 = vadd.f32 %v1481_v9, %v1799_v5  ;;  %v1826_v14 = vadd.f32 %v1485_v10, %v1799_v5  ;;  %v801_v15 = vsel %vm429_vm1, %v773_v11, -inf  ;;  %v789_v16 = vsel %vm429_vm1, %v769_v12, -inf }
 0x397   :  { %802 = vmax.xlane.f32.xlu0 %v801_v15  ;;  %790 = vmax.xlane.f32.xlu1 %v789_v16  ;;  %v853_v23 = vsel %vm429_vm1, %v833_v18, -inf  ;;  %v751_v28 = vsel %vm1801_vm2, %v1833_v19, -inf  ;;  %v691_v29 = vpop.f32.mrf.mxu1  ;;  %v865_v30 = vsel %vm429_vm1, %v837_v25, -inf  ;;  %v755_v35 = vsel %vm1801_vm2, %v1850_v27, -inf  ;;  %v675_v36 = vpop.f32.mrf.mxu0 }
 0x398   :  { %v754_v20 = vsel %vm1801_vm2, %v1823_v13, -inf  ;;  %v758_v21 = vsel %vm1801_vm2, %v1826_v14, -inf  ;;  %v767_v33 = vsel %vm737_vm3, %v751_v28, -inf  ;;  %v1862_v34 = vadd.f32 %v1799_v5, %v691_v29 }
 0x399   :  { %v770_v22 = vsel %vm737_vm3, %v754_v20, -inf  ;;  %v774_v26 = vsel %vm737_vm3, %v758_v21, -inf  ;;  %v834_v32 = vsel %vm737_vm3, -inf, %v754_v20  ;;  %v783_v38 = vsel %vm429_vm1, %v767_v33, -inf  ;;  %v1488_v41 = vpop.f32.mrf.mxu1 }
 0x39a   :  { %v792_v24 = vsel %vm429_vm1, %v770_v22, -inf  ;;  %v804_v31 = vsel %vm429_vm1, %v774_v26, -inf  ;;  %v856_v37 = vsel %vm429_vm1, %v834_v32, -inf  ;;  %v838_v39 = vsel %vm737_vm3, -inf, %v758_v21 }
 0x39b   :  { %854 = vmax.xlane.f32.xlu0 %v853_v23  ;;  %793 = vmax.xlane.f32.xlu1 %v792_v24  ;;  %v771_v40 = vsel %vm737_vm3, %v755_v35, -inf  ;;  %v1874_v42 = vadd.f32 %v1799_v5, %v675_v36  ;;  %v756_v43 = vsel %vm1801_vm2, %v1862_v34, -inf  ;;  %v868_v45 = vsel %vm429_vm1, %v838_v39, -inf  ;;  %v704_v52 = vpop.f32.mrf.mxu1 }
 0x39c   :  { %v795_v51 = vsel %vm429_vm1, %v771_v40, -inf  ;;  %v772_v53 = vsel %vm737_vm3, %v756_v43, -inf  ;;  %v831_v54 = vsel %vm737_vm3, -inf, %v751_v28  ;;  %v835_v60 = vsel %vm737_vm3, -inf, %v755_v35 }
 0x39d   :  { %v752_v55 = vsel %vm1801_vm2, %v1874_v42, -inf  ;;  %v798_v56 = vsel %vm429_vm1, %v772_v53, -inf  ;;  %v847_v57 = vsel %vm429_vm1, %v831_v54, -inf  ;;  %v1489_v58 = vpop.f32.mrf.mxu1  ;;  %v1895_v17 = vadd.f32 %v1488_v41, %v1799_v5 }
 0x39e   :  { %v832_v59 = vsel %vm737_vm3, -inf, %v752_v55  ;;  %v1898_v61 = vadd.f32 %v1489_v58, %v1799_v5  ;;  %v859_v63 = vsel %vm429_vm1, %v835_v60, -inf  ;;  %v836_v1 = vsel %vm737_vm3, -inf, %v756_v43 }
 0x39f   :  { %866 = vmax.xlane.f32.xlu0 %v865_v30  ;;  %805 = vmax.xlane.f32.xlu1 %v804_v31  ;;  %v850_v62 = vsel %vm429_vm1, %v832_v59, -inf  ;;  %v707_v0 = vpop.f32.mrf.mxu1  ;;  %v768_v2 = vsel %vm737_vm3, %v752_v55, -inf  ;;  %v761_v44 = vsel %vm1801_vm2, %v1895_v17, -inf  ;;  %v862_v50 = vsel %vm429_vm1, %v836_v1, -inf }
 0x3a0   :  { %v762_v4 = vsel %vm1801_vm2, %v1898_v61, -inf  ;;  %v786_v6 = vsel %vm429_vm1, %v768_v2, -inf  ;;  %v777_v8 = vsel %vm737_vm3, %v761_v44, -inf  ;;  %v1919_v9 = vadd.f32 %v1799_v5, %v704_v52 }
 0x3a1   :  { %v1492_v46 = vpop.f32.mrf.mxu1  ;;  %v778_v7 = vsel %vm737_vm3, %v762_v4, -inf  ;;  %v1922_v10 = vadd.f32 %v1799_v5, %v707_v0  ;;  %v813_v15 = vsel %vm429_vm1, %v777_v8, -inf  ;;  %v842_v16 = vsel %vm737_vm3, -inf, %v762_v4 }
 0x3a2   :  { %v816_v12 = vsel %vm429_vm1, %v778_v7, -inf  ;;  %v841_v18 = vsel %vm737_vm3, -inf, %v761_v44  ;;  %v759_v21 = vsel %vm1801_vm2, %v1919_v9, -inf  ;;  %v880_v23 = vsel %vm429_vm1, %v842_v16, -inf }
 0x3a3   :  { %857 = vmax.xlane.f32.xlu1 %v856_v37  ;;  %784 = vmax.xlane.f32.xlu0 %v783_v38  ;;  %v720_v11 = vpop.f32.mrf.mxu1  ;;  %v760_v20 = vsel %vm1801_vm2, %v1922_v10, -inf  ;;  %v877_v24 = vsel %vm429_vm1, %v841_v18, -inf  ;;  %v775_v26 = vsel %vm737_vm3, %v759_v21, -inf  ;;  %v1943_v28 = vadd.f32 %v1492_v46, %v1799_v5 }
 0x3a4   :  { %v776_v25 = vsel %vm737_vm3, %v760_v20, -inf  ;;  %v807_v32 = vsel %vm429_vm1, %v775_v26, -inf  ;;  %v840_v33 = vsel %vm737_vm3, -inf, %v760_v20  ;;  %v839_v35 = vsel %vm737_vm3, -inf, %v759_v21 }
 0x3a5   :  { %v1493_v22 = vpop.f32.mrf.mxu1  ;;  %2459 = vst [vmem:[#allocation2_spill] sm:$0xff] %v1943_v28  ;;  %v810_v31 = vsel %vm429_vm1, %v776_v25, -inf  ;;  %v1955_v36 = vadd.f32 %v1799_v5, %v720_v11  ;;  %v765_v39 = vsel %vm1801_vm2, %v1943_v28, -inf  ;;  %v874_v40 = vsel %vm429_vm1, %v840_v33, -inf }
 0x3a6   :  { %v1946_v29 = vadd.f32 %v1493_v22, %v1799_v5  ;;  %v871_v41 = vsel %vm429_vm1, %v839_v35, -inf  ;;  %v845_v0 = vsel %vm737_vm3, -inf, %v765_v39 }
 0x3a7   :  { %869 = vmax.xlane.f32.xlu1 %v868_v45  ;;  %796 = vmax.xlane.f32.xlu0 %v795_v51  ;;  %v723_v30 = vpop.f32.mrf.mxu1  ;;  %v763_v51 = vsel %vm1801_vm2, %v1955_v36, -inf  ;;  %v889_v2 = vsel %vm429_vm1, %v845_v0, -inf }
 0x3a8   :  { %2460 = vst [vmem:[#allocation3_spill] sm:$0xff] %v1946_v29  ;;  %v1958_v37 = vadd.f32 %v1799_v5, %v723_v30  ;;  %v766_v38 = vsel %vm1801_vm2, %v1946_v29, -inf  ;;  %v781_v5 = vsel %vm737_vm3, %v765_v39, -inf  ;;  %v779_v55 = vsel %vm737_vm3, %v763_v51, -inf }
 0x3a9   :  { %v782_v43 = vsel %vm737_vm3, %v766_v38, -inf  ;;  %v825_v53 = vsel %vm429_vm1, %v781_v5, -inf  ;;  %v843_v59 = vsel %vm737_vm3, -inf, %v763_v51 }
 0x3aa   :  { %v764_v45 = vsel %vm1801_vm2, %v1958_v37, -inf  ;;  %v828_v52 = vsel %vm429_vm1, %v782_v43, -inf }
 0x3ab   :  { %799 = vmax.xlane.f32.xlu1 %v798_v56  ;;  %848 = vmax.xlane.f32.xlu0 %v847_v57  ;;  %v780_v54 = vsel %vm737_vm3, %v764_v45, -inf  ;;  %v819_v57 = vsel %vm429_vm1, %v779_v55, -inf  ;;  %v844_v58 = vsel %vm737_vm3, -inf, %v764_v45 }
 0x3ac   :  { %v822_v56 = vsel %vm429_vm1, %v780_v54, -inf  ;;  %v886_v60 = vsel %vm429_vm1, %v844_v58, -inf }
 0x3af   :  { %851 = vmax.xlane.f32.xlu1 %v850_v62  ;;  %860 = vmax.xlane.f32.xlu0 %v859_v63  ;;  %v883_v62 = vsel %vm429_vm1, %v843_v59, -inf  ;;  %v846_v63 = vsel %vm737_vm3, -inf, %v766_v38 }
 0x3b0   :  { %v892_v1 = vsel %vm429_vm1, %v846_v63, -inf }
 0x3b3   :  { %863 = vmax.xlane.f32.xlu1 %v862_v50  ;;  %787 = vmax.xlane.f32.xlu0 %v786_v6 }
 0x3b7   :  { %817 = vmax.xlane.f32.xlu1 %v816_v12  ;;  %814 = vmax.xlane.f32.xlu0 %v813_v15 }
 0x3bb   :  { %881 = vmax.xlane.f32.xlu1 %v880_v23  ;;  %878 = vmax.xlane.f32.xlu0 %v877_v24 }
 0x3bf   :  { %811 = vmax.xlane.f32.xlu1 %v810_v31  ;;  %808 = vmax.xlane.f32.xlu0 %v807_v32 }
 0x3c3   :  { %875 = vmax.xlane.f32.xlu1 %v874_v40  ;;  %872 = vmax.xlane.f32.xlu0 %v871_v41 }
 0x3c7   :  { %829 = vmax.xlane.f32.xlu1 %v828_v52  ;;  %826 = vmax.xlane.f32.xlu0 %v825_v53 }
 0x3cb   :  { %823 = vmax.xlane.f32.xlu1 %v822_v56  ;;  %820 = vmax.xlane.f32.xlu0 %v819_v57 }
 0x3cf   :  { %887 = vmax.xlane.f32.xlu1 %v886_v60  ;;  %884 = vmax.xlane.f32.xlu0 %v883_v62 }
 0x3d3   :  { %893 = vmax.xlane.f32.xlu1 %v892_v1  ;;  %890 = vmax.xlane.f32.xlu0 %v889_v2 }
 0x420   :  { %v1998_v4 = vpop.xlane.xlu0 %802  ;;  %v2000_v44 = vpop.xlane.xlu1 %790 }
 0x424   :  { %v2002_v46 = vpop.xlane.xlu0 %854  ;;  %v2004_v50 = vpop.xlane.xlu1 %793 }
 0x425   :  { %v897_v6 = vsel %vm737_vm3, %v2000_v44, %v2002_v46 }
 0x426   :  { %v913_v7 = vsub.f32 %v1806_v48, %v897_v6 }
 0x428   :  { %v931_v8 = vmul.f32 1.442695, %v913_v7  ;;  %v2011_v11 = vpop.xlane.xlu0 %866  ;;  %v2013_v12 = vpop.xlane.xlu1 %805 }
 0x429   :  { %v901_v15 = vsel %vm737_vm3, %v1998_v4, %v2011_v11 }
 0x42a   :  { %1518 = vpow2.f32 %v931_v8  ;;  %v917_v16 = vsub.f32 %v1809_v49, %v901_v15 }
 0x42c   :  { %v939_v18 = vmul.f32 1.442695, %v917_v16  ;;  %v2020_v20 = vpop.xlane.xlu1 %857  ;;  %v2022_v21 = vpop.xlane.xlu0 %784 }
 0x42d   :  { %v898_v22 = vsel %vm737_vm3, %v2004_v50, %v2020_v20 }
 0x42e   :  { %1520 = vpow2.f32 %v939_v18  ;;  %v914_v23 = vsub.f32 %v1823_v13, %v898_v22 }
 0x430   :  { %v933_v24 = vmul.f32 1.442695, %v914_v23  ;;  %v2029_v25 = vpop.xlane.xlu1 %869  ;;  %v2031_v26 = vpop.xlane.xlu0 %796 }
 0x431   :  { %v902_v30 = vsel %vm737_vm3, %v2013_v12, %v2029_v25 }
 0x432   :  { %1522 = vpow2.f32 %v933_v24  ;;  %v918_v31 = vsub.f32 %v1826_v14, %v902_v30 }
 0x434   :  { %v941_v32 = vmul.f32 1.442695, %v918_v31  ;;  %v2038_v33 = vpop.xlane.xlu1 %799  ;;  %v2040_v35 = vpop.xlane.xlu0 %848 }
 0x435   :  { %v895_v38 = vsel %vm737_vm3, %v2022_v21, %v2040_v35 }
 0x436   :  { %1524 = vpow2.f32 %v941_v32  ;;  %v911_v39 = vsub.f32 %v1833_v19, %v895_v38 }
 0x437   :  { %v1519_v40 = vpop.eup %1518 }
 0x438   :  { %v927_v41 = vmul.f32 1.442695, %v911_v39  ;;  %v2047_v43 = vpop.xlane.xlu1 %851  ;;  %v2049_v5 = vpop.xlane.xlu0 %860  ;;  %v961_v45 = vsel %vm1801_vm2, %v1519_v40, 0.0 }
 0x439   :  { %v899_v51 = vsel %vm737_vm3, %v2031_v26, %v2049_v5  ;;  %v977_v52 = vsel %vm737_vm3, %v961_v45, 0.0  ;;  %v1041_v7 = vsel %vm737_vm3, 0.0, %v961_v45 }
 0x43a   :  { %1526 = vpow2.f32 %v927_v41  ;;  %v915_v53 = vsub.f32 %v1850_v27, %v899_v51  ;;  %v997_v54 = vsel %vm429_vm1, %v977_v52, 0.0  ;;  %v1061_v30 = vsel %vm429_vm1, %v1041_v7, 0.0 }
 0x43b   :  { %v1521_v55 = vpop.eup %1520  ;;  %998 = vadd.xlane.f32.xlu0 %v997_v54 }
 0x43c   :  { %v935_v56 = vmul.f32 1.442695, %v915_v53  ;;  %v2061_v57 = vpop.xlane.xlu1 %863  ;;  %v2063_v58 = vpop.xlane.xlu0 %787  ;;  %v965_v59 = vsel %vm1801_vm2, %v1521_v55, 0.0 }
 0x43d   :  { %v900_v60 = vsel %vm737_vm3, %v2038_v33, %v2061_v57  ;;  %v896_v62 = vsel %vm737_vm3, %v2063_v58, %v2047_v43  ;;  %v981_v63 = vsel %vm737_vm3, %v965_v59, 0.0  ;;  %v1045_v32 = vsel %vm737_vm3, 0.0, %v965_v59 }
 0x43e   :  { %1528 = vpow2.f32 %v935_v56  ;;  %v916_v0 = vsub.f32 %v1862_v34, %v900_v60  ;;  %v912_v1 = vsub.f32 %v1874_v42, %v896_v62  ;;  %v1009_v2 = vsel %vm429_vm1, %v981_v63, 0.0 }
 0x43f   :  { %v1523_v6 = vpop.eup %1522  ;;  %1010 = vadd.xlane.f32.xlu0 %v1009_v2  ;;  %v1073_v55 = vsel %vm429_vm1, %v1045_v32, 0.0 }
 0x440   :  { %v937_v8 = vmul.f32 1.442695, %v916_v0  ;;  %v929_v15 = vmul.f32 1.442695, %v912_v1  ;;  %v2082_v16 = vpop.xlane.xlu1 %817  ;;  %v2084_v18 = vpop.xlane.xlu0 %814  ;;  %v962_v22 = vsel %vm1801_vm2, %v1523_v6, 0.0 }
 0x441   :  { %v978_v23 = vsel %vm737_vm3, %v962_v22, 0.0  ;;  %v1042_v59 = vsel %vm737_vm3, 0.0, %v962_v22 }
 0x442   :  { %1530 = vpow2.f32 %v937_v8  ;;  %v1000_v24 = vsel %vm429_vm1, %v978_v23, 0.0  ;;  %v1064_v6 = vsel %vm429_vm1, %v1042_v59, 0.0 }
 0x443   :  { %v1525_v31 = vpop.eup %1524  ;;  %1532 = vpow2.f32 %v929_v15  ;;  %1001 = vadd.xlane.f32.xlu1 %v1000_v24  ;;  %1062 = vadd.xlane.f32.xlu0 %v1061_v30 }
 0x444   :  { %v2094_v38 = vpop.xlane.xlu1 %881  ;;  %v2096_v39 = vpop.xlane.xlu0 %878  ;;  %v966_v40 = vsel %vm1801_vm2, %v1525_v31, 0.0 }
 0x445   :  { %v906_v41 = vsel %vm737_vm3, %v2082_v16, %v2094_v38  ;;  %v905_v45 = vsel %vm737_vm3, %v2084_v18, %v2096_v39  ;;  %v982_v51 = vsel %vm737_vm3, %v966_v40, 0.0  ;;  %v1046_v15 = vsel %vm737_vm3, 0.0, %v966_v40 }
 0x446   :  { %v922_v52 = vsub.f32 %v1898_v61, %v906_v41  ;;  %v921_v53 = vsub.f32 %v1895_v17, %v905_v45  ;;  %v1012_v54 = vsel %vm429_vm1, %v982_v51, 0.0  ;;  %v1076_v45 = vsel %vm429_vm1, %v1046_v15, 0.0 }
 0x447   :  { %v1527_v56 = vpop.eup %1526  ;;  %1013 = vadd.xlane.f32.xlu1 %v1012_v54  ;;  %1074 = vadd.xlane.f32.xlu0 %v1073_v55 }
 0x448   :  { %v947_v60 = vmul.f32 1.442695, %v921_v53  ;;  %v2116_v62 = vpop.xlane.xlu1 %811  ;;  %v2118_v63 = vpop.xlane.xlu0 %808  ;;  %v959_v0 = vsel %vm1801_vm2, %v1527_v56, 0.0  ;;  %v949_v1 = vmul.f32 1.442695, %v922_v52 }
 0x449   :  { %v975_v2 = vsel %vm737_vm3, %v959_v0, 0.0  ;;  %v1039_v53 = vsel %vm737_vm3, 0.0, %v959_v0 }
 0x44a   :  { %v991_v7 = vsel %vm429_vm1, %v975_v2, 0.0  ;;  %1534 = vpow2.f32 %v947_v60 }
 0x44b   :  { %v1529_v8 = vpop.eup %1528  ;;  %1065 = vadd.xlane.f32.xlu1 %v1064_v6  ;;  %992 = vadd.xlane.f32.xlu0 %v991_v7  ;;  %1536 = vpow2.f32 %v949_v1  ;;  %v1055_v6 = vsel %vm429_vm1, %v1039_v53, 0.0 }
 0x44c   :  { %v2128_v22 = vpop.xlane.xlu1 %875  ;;  %v2130_v23 = vpop.xlane.xlu0 %872  ;;  %v963_v24 = vsel %vm1801_vm2, %v1529_v8, 0.0 }
 0x44d   :  { %v904_v30 = vsel %vm737_vm3, %v2116_v62, %v2128_v22  ;;  %v903_v31 = vsel %vm737_vm3, %v2118_v63, %v2130_v23  ;;  %v979_v32 = vsel %vm737_vm3, %v963_v24, 0.0  ;;  %v1043_v8 = vsel %vm737_vm3, 0.0, %v963_v24 }
 0x44e   :  { %v920_v40 = vsub.f32 %v1922_v10, %v904_v30  ;;  %v919_v41 = vsub.f32 %v1919_v9, %v903_v31  ;;  %v1003_v51 = vsel %vm429_vm1, %v979_v32, 0.0  ;;  %v1067_v32 = vsel %vm429_vm1, %v1043_v8, 0.0 }
 0x44f   :  { %v1531_v52 = vpop.eup %1530  ;;  %1077 = vadd.xlane.f32.xlu1 %v1076_v45  ;;  %1004 = vadd.xlane.f32.xlu0 %v1003_v51 }
 0x450   :  { %v1533_v54 = vpop.eup %1532  ;;  %v943_v55 = vmul.f32 1.442695, %v919_v41  ;;  %v2150_v56 = vpop.xlane.xlu1 %829  ;;  %v945_v60 = vmul.f32 1.442695, %v920_v40  ;;  %v964_v2 = vsel %vm1801_vm2, %v1531_v52, 0.0 }
 0x451   :  { %v2152_v59 = vpop.xlane.xlu0 %826  ;;  %v960_v1 = vsel %vm1801_vm2, %v1533_v54, 0.0  ;;  %v980_v31 = vsel %vm737_vm3, %v964_v2, 0.0 }
 0x452   :  { %v976_v7 = vsel %vm737_vm3, %v960_v1, 0.0  ;;  %1538 = vpow2.f32 %v943_v55  ;;  %v1006_v40 = vsel %vm429_vm1, %v980_v31, 0.0  ;;  %v1040_v24 = vsel %vm737_vm3, 0.0, %v960_v1 }
 0x453   :  { %1056 = vadd.xlane.f32.xlu0 %v1055_v6  ;;  %v994_v0 = vsel %vm429_vm1, %v976_v7, 0.0  ;;  %1540 = vpow2.f32 %v945_v60  ;;  %v1058_v7 = vsel %vm429_vm1, %v1040_v24, 0.0 }
 0x454   :  { %995 = vadd.xlane.f32.xlu1 %v994_v0  ;;  %v2164_v15 = vpop.xlane.xlu1 %823 }
 0x455   :  { %v2166_v30 = vpop.xlane.xlu0 %820 }
 0x457   :  { %1068 = vadd.xlane.f32.xlu0 %v1067_v32  ;;  %v1535_v41 = vpop.eup %1534 }
 0x458   :  { %1007 = vadd.xlane.f32.xlu1 %v1006_v40  ;;  %v2172_v45 = vpop.xlane.xlu1 %887  ;;  %v969_v54 = vsel %vm1801_vm2, %v1535_v41, 0.0  ;;  %v1537_v55 = vpop.eup %1536  ;;  %v1044_v40 = vsel %vm737_vm3, 0.0, %v964_v2 }
 0x459   :  { %v2174_v51 = vpop.xlane.xlu0 %884  ;;  %v908_v52 = vsel %vm737_vm3, %v2164_v15, %v2172_v45  ;;  %v985_v1 = vsel %vm737_vm3, %v969_v54, 0.0  ;;  %v1049_v41 = vsel %vm737_vm3, 0.0, %v969_v54  ;;  %v1070_v54 = vsel %vm429_vm1, %v1044_v40, 0.0 }
 0x45a   :  { %v907_v53 = vsel %vm737_vm3, %v2166_v30, %v2174_v51  ;;  %v924_v60 = vsub.f32 %v1958_v37, %v908_v52  ;;  %v1021_v0 = vsel %vm429_vm1, %v985_v1, 0.0 }
 0x45b   :  { %v923_v6 = vsub.f32 %v1955_v36, %v907_v53  ;;  %1022 = vadd.xlane.f32.xlu0 %v1021_v0 }
 0x45c   :  { %v953_v8 = vmul.f32 1.442695, %v924_v60  ;;  %1059 = vadd.xlane.f32.xlu1 %v1058_v7  ;;  %v2194_v31 = vpop.xlane.xlu1 %893  ;;  %v970_v60 = vsel %vm1801_vm2, %v1537_v55, 0.0 }
 0x45d   :  { %2461 = vst [vmem:[#allocation4_spill] sm:$0xff] %v2194_v31  ;;  %v2196_v32 = vpop.xlane.xlu0 %890  ;;  %v951_v52 = vmul.f32 1.442695, %v923_v6  ;;  %v910_v24 = vsel %vm737_vm3, %v2150_v56, %v2194_v31  ;;  %v1085_v6 = vsel %vm429_vm1, %v1049_v41, 0.0 }
 0x45e   :  { %2462 = vst [vmem:[#allocation5_spill] sm:$0xff] %v2196_v32  ;;  %v909_v53 = vsel %vm737_vm3, %v2152_v59, %v2196_v32  ;;  %v926_v1 = vsub.f32 %v1946_v29, %v910_v24  ;;  %1542 = vpow2.f32 %v953_v8  ;;  %v986_v32 = vsel %vm737_vm3, %v970_v60, 0.0 }
 0x45f   :  { %v925_v2 = vsub.f32 %v1943_v28, %v909_v53  ;;  %v1539_v7 = vpop.eup %1538  ;;  %1086 = vadd.xlane.f32.xlu0 %v1085_v6  ;;  %1544 = vpow2.f32 %v951_v52  ;;  %v1024_v41 = vsel %vm429_vm1, %v986_v32, 0.0  ;;  %v1050_v53 = vsel %vm737_vm3, 0.0, %v970_v60 }
 0x460   :  { %v957_v0 = vmul.f32 1.442695, %v926_v1  ;;  %1071 = vadd.xlane.f32.xlu1 %v1070_v54  ;;  %v967_v55 = vsel %vm1801_vm2, %v1539_v7, 0.0  ;;  %v1541_v24 = vpop.eup %1540 }
 0x461   :  { %v955_v31 = vmul.f32 1.442695, %v925_v2  ;;  %v983_v40 = vsel %vm737_vm3, %v967_v55, 0.0  ;;  %v1047_v52 = vsel %vm737_vm3, 0.0, %v967_v55  ;;  %v968_v1 = vsel %vm1801_vm2, %v1541_v24, 0.0 }
 0x462   :  { %1546 = vpow2.f32 %v957_v0  ;;  %v1015_v8 = vsel %vm429_vm1, %v983_v40, 0.0  ;;  %v1088_v2 = vsel %vm429_vm1, %v1050_v53, 0.0  ;;  %v1079_v54 = vsel %vm429_vm1, %v1047_v52, 0.0 }
 0x463   :  { %1548 = vpow2.f32 %v955_v31  ;;  %1016 = vadd.xlane.f32.xlu0 %v1015_v8  ;;  %v984_v31 = vsel %vm737_vm3, %v968_v1, 0.0  ;;  %v1048_v60 = vsel %vm737_vm3, 0.0, %v968_v1 }
 0x464   :  { %1025 = vadd.xlane.f32.xlu1 %v1024_v41  ;;  %v1018_v32 = vsel %vm429_vm1, %v984_v31, 0.0  ;;  %v1082_v55 = vsel %vm429_vm1, %v1048_v60, 0.0 }
 0x467   :  { %1080 = vadd.xlane.f32.xlu0 %v1079_v54 }
 0x468   :  { %1089 = vadd.xlane.f32.xlu1 %v1088_v2 }
 0x46b   :  { %v1543_v6 = vpop.eup %1542 }
 0x46c   :  { %1019 = vadd.xlane.f32.xlu1 %v1018_v32  ;;  %v1545_v7 = vpop.eup %1544  ;;  %v972_v53 = vsel %vm1801_vm2, %v1543_v6, 0.0 }
 0x46d   :  { %v971_v52 = vsel %vm1801_vm2, %v1545_v7, 0.0  ;;  %v988_v31 = vsel %vm737_vm3, %v972_v53, 0.0  ;;  %v1052_v7 = vsel %vm737_vm3, 0.0, %v972_v53 }
 0x46e   :  { %v987_v32 = vsel %vm737_vm3, %v971_v52, 0.0  ;;  %v1030_v60 = vsel %vm429_vm1, %v988_v31, 0.0 }
 0x46f   :  { %v1547_v0 = vpop.eup %1546  ;;  %v1027_v6 = vsel %vm429_vm1, %v987_v32, 0.0 }
 0x470   :  { %v1549_v24 = vpop.eup %1548  ;;  %1083 = vadd.xlane.f32.xlu1 %v1082_v55  ;;  %v974_v40 = vsel %vm1801_vm2, %v1547_v0, 0.0  ;;  %v1051_v0 = vsel %vm737_vm3, 0.0, %v971_v52  ;;  %v1094_v55 = vsel %vm429_vm1, %v1052_v7, 0.0 }
 0x471   :  { %v990_v41 = vsel %vm737_vm3, %v974_v40, 0.0  ;;  %v973_v8 = vsel %vm1801_vm2, %v1549_v24, 0.0  ;;  %v1091_v24 = vsel %vm429_vm1, %v1051_v0, 0.0 }
 0x472   :  { %v1036_v1 = vsel %vm429_vm1, %v990_v41, 0.0  ;;  %v989_v2 = vsel %vm737_vm3, %v973_v8, 0.0  ;;  %v1054_v41 = vsel %vm737_vm3, 0.0, %v974_v40 }
 0x473   :  { %v1033_v54 = vsel %vm429_vm1, %v989_v2, 0.0  ;;  %v1100_v2 = vsel %vm429_vm1, %v1054_v41, 0.0 }
 0x474   :  { %1037 = vadd.xlane.f32.xlu1 %v1036_v1  ;;  %1034 = vadd.xlane.f32.xlu0 %v1033_v54  ;;  %v1053_v1 = vsel %vm737_vm3, 0.0, %v973_v8 }
 0x475   :  { %v1097_v54 = vsel %vm429_vm1, %v1053_v1, 0.0 }
 0x478   :  { %1031 = vadd.xlane.f32.xlu1 %v1030_v60  ;;  %1028 = vadd.xlane.f32.xlu0 %v1027_v6 }
 0x47c   :  { %1095 = vadd.xlane.f32.xlu1 %v1094_v55  ;;  %1092 = vadd.xlane.f32.xlu0 %v1091_v24 }
 0x480   :  { %1101 = vadd.xlane.f32.xlu1 %v1100_v2  ;;  %1098 = vadd.xlane.f32.xlu0 %v1097_v54 }
 0x4c4   :  { %v999_v53 = vpop.xlane.xlu0 %998 }
 0x4c5   :  { %1550 = vlog2.f32 %v999_v53 }
 0x4c8   :  { %v1011_v52 = vpop.xlane.xlu0 %1010 }
 0x4c9   :  { %1552 = vlog2.f32 %v1011_v52 }
 0x4cc   :  { %v1002_v31 = vpop.xlane.xlu1 %1001  ;;  %v1063_v32 = vpop.xlane.xlu0 %1062 }
 0x4cd   :  { %1554 = vlog2.f32 %v1063_v32 }
 0x4ce   :  { %1556 = vlog2.f32 %v1002_v31 }
 0x4d0   :  { %v1014_v60 = vpop.xlane.xlu1 %1013  ;;  %v1075_v6 = vpop.xlane.xlu0 %1074 }
 0x4d1   :  { %1558 = vlog2.f32 %v1075_v6 }
 0x4d2   :  { %1560 = vlog2.f32 %v1014_v60  ;;  %v1551_v7 = vpop.eup %1550 }
 0x4d3   :  { %v1108_v41 = vmul.f32 0.6931472, %v1551_v7 }
 0x4d4   :  { %v1066_v40 = vpop.xlane.xlu1 %1065  ;;  %v993_v8 = vpop.xlane.xlu0 %992 }
 0x4d5   :  { %1562 = vlog2.f32 %v1066_v40  ;;  %v1137_v31 = vadd.f32 %v1108_v41, %v2000_v44 }
 0x4d6   :  { %1564 = vlog2.f32 %v993_v8  ;;  %v1553_v24 = vpop.eup %1552 }
 0x4d7   :  { %v1116_v32 = vmul.f32 0.6931472, %v1553_v24 }
 0x4d8   :  { %v1078_v0 = vpop.xlane.xlu1 %1077  ;;  %v1005_v55 = vpop.xlane.xlu0 %1004 }
 0x4d9   :  { %1566 = vlog2.f32 %v1078_v0 }
 0x4da   :  { %v1555_v1 = vpop.eup %1554  ;;  %1568 = vlog2.f32 %v1005_v55 }
 0x4db   :  { %v1156_v2 = vmul.f32 0.6931472, %v1555_v1  ;;  %v1557_v53 = vpop.eup %1556 }
 0x4dc   :  { %v1057_v54 = vpop.xlane.xlu0 %1056  ;;  %v1110_v40 = vmul.f32 0.6931472, %v1557_v53 }
 0x4dd   :  { %v996_v52 = vpop.xlane.xlu1 %995  ;;  %1570 = vlog2.f32 %v1057_v54  ;;  %v1185_v60 = vadd.f32 %v1156_v2, %v2002_v46  ;;  %v1141_v54 = vadd.f32 %v1116_v32, %v1998_v4 }
 0x4de   :  { %v1559_v6 = vpop.eup %1558  ;;  %1572 = vlog2.f32 %v996_v52  ;;  %v1138_v41 = vadd.f32 %v1110_v40, %v2004_v50 }
 0x4df   :  { %v1201_v8 = vsel %vm737_vm3, %v1137_v31, %v1185_v60  ;;  %v1164_v0 = vmul.f32 0.6931472, %v1559_v6  ;;  %v1561_v28 = vpop.eup %1560 }
 0x4e0   :  { %v1069_v7 = vpop.xlane.xlu0 %1068  ;;  %v1217_v55 = vsub.f32 %v1806_v48, %v1201_v8  ;;  %v1118_v53 = vmul.f32 0.6931472, %v1561_v28 }
 0x4e1   :  { %v1008_v1 = vpop.xlane.xlu1 %1007  ;;  %1574 = vlog2.f32 %v1069_v7  ;;  %v1189_v44 = vadd.f32 %v1164_v0, %v2011_v11 }
 0x4e2   :  { %v1563_v29 = vpop.eup %1562  ;;  %v1233_v46 = vsel %vm1801_vm2, %v1217_v55, 0.0  ;;  %1576 = vlog2.f32 %v1008_v1 }
 0x4e3   :  { %v1158_v24 = vmul.f32 0.6931472, %v1563_v29  ;;  %1249 = vst.msk [vmem:[%s2452_s6 + $0x10] sm:$0xff] %vm429_vm1, %v1233_v46  ;;  %v1205_v48 = vsel %vm737_vm3, %v1141_v54, %v1189_v44  ;;  %v1565_v2 = vpop.eup %1564 }
 0x4e4   :  { %v1221_v4 = vsub.f32 %v1809_v49, %v1205_v48  ;;  %v1023_v31 = vpop.xlane.xlu0 %1022  ;;  %v1104_v6 = vmul.f32 0.6931472, %v1565_v2 }
 0x4e5   :  { %v1186_v11 = vadd.f32 %v1158_v24, %v2020_v20  ;;  %v1060_v52 = vpop.xlane.xlu1 %1059  ;;  %v1142_v20 = vadd.f32 %v1118_v53, %v2013_v12 }
 0x4e6   :  { %v1567_v29 = vpop.eup %1566  ;;  %1578 = vlog2.f32 %v1060_v52  ;;  %v1237_v50 = vsel %vm1801_vm2, %v1221_v4, 0.0  ;;  %v1135_v54 = vadd.f32 %v1104_v6, %v2022_v21 }
 0x4e7   :  { %v1202_v32 = vsel %vm737_vm3, %v1138_v41, %v1186_v11  ;;  %v1166_v60 = vmul.f32 0.6931472, %v1567_v29  ;;  %1580 = vlog2.f32 %v1023_v31  ;;  %1253 = vst.msk [vmem:[%s2452_s6 + $0x30] sm:$0xff] %vm429_vm1, %v1237_v50  ;;  %v1569_v28 = vpop.eup %1568 }
 0x4e8   :  { %v1218_v49 = vsub.f32 %v1823_v13, %v1202_v32  ;;  %v1087_v0 = vpop.xlane.xlu0 %1086  ;;  %v1112_v44 = vmul.f32 0.6931472, %v1569_v28 }
 0x4e9   :  { %v1190_v40 = vadd.f32 %v1166_v60, %v2029_v25  ;;  %v1072_v8 = vpop.xlane.xlu1 %1071 }
 0x4ea   :  { %v1571_v7 = vpop.eup %1570  ;;  %v1234_v55 = vsel %vm1801_vm2, %v1218_v49, 0.0  ;;  %1582 = vlog2.f32 %v1072_v8 }
 0x4eb   :  { %1250 = vst.msk [vmem:[%s2452_s6 + $0x18] sm:$0xff] %vm429_vm1, %v1234_v55  ;;  %v1206_v13 = vsel %vm737_vm3, %v1142_v20, %v1190_v40  ;;  %v1152_v1 = vmul.f32 0.6931472, %v1571_v7  ;;  %1584 = vlog2.f32 %v1087_v0  ;;  %v1573_v25 = vpop.eup %1572 }
 0x4ec   :  { %v1222_v12 = vsub.f32 %v1826_v14, %v1206_v13  ;;  %v1017_v41 = vpop.xlane.xlu0 %1016  ;;  %v1106_v4 = vmul.f32 0.6931472, %v1573_v25 }
 0x4ed   :  { %v1183_v46 = vadd.f32 %v1152_v1, %v2040_v35  ;;  %v1026_v24 = vpop.xlane.xlu1 %1025  ;;  %v1139_v35 = vadd.f32 %v1112_v44, %v2031_v26 }
 0x4ee   :  { %v1575_v48 = vpop.eup %1574  ;;  %v1238_v2 = vsel %vm1801_vm2, %v1222_v12, 0.0  ;;  %1586 = vlog2.f32 %v1026_v24  ;;  %v1136_v49 = vadd.f32 %v1106_v4, %v2063_v58 }
 0x4ef   :  { %1254 = vst.msk [vmem:[%s2452_s6 + $0x38] sm:$0xff] %vm429_vm1, %v1238_v2  ;;  %v1199_v14 = vsel %vm737_vm3, %v1135_v54, %v1183_v46  ;;  %v1160_v53 = vmul.f32 0.6931472, %v1575_v48  ;;  %1588 = vlog2.f32 %v1017_v41  ;;  %v1577_v29 = vpop.eup %1576 }
 0x4f0   :  { %v1215_v21 = vsub.f32 %v1833_v19, %v1199_v14  ;;  %v1081_v31 = vpop.xlane.xlu0 %1080  ;;  %v1114_v20 = vmul.f32 0.6931472, %v1577_v29 }
 0x4f1   :  { %v1187_v11 = vadd.f32 %v1160_v53, %v2049_v5  ;;  %v1090_v52 = vpop.xlane.xlu1 %1089 }
 0x4f2   :  { %v1231_v50 = vsel %vm1801_vm2, %v1215_v21, 0.0  ;;  %1590 = vlog2.f32 %v1090_v52  ;;  %v1140_v12 = vadd.f32 %v1114_v20, %v2038_v33 }
 0x4f3   :  { %v1579_v32 = vpop.eup %1578  ;;  %1247 = vst.msk [vmem:[%s2452_s6] sm:$0xff] %vm429_vm1, %v1231_v50  ;;  %v1203_v19 = vsel %vm737_vm3, %v1139_v35, %v1187_v11  ;;  %1592 = vlog2.f32 %v1081_v31 }
 0x4f4   :  { %v1581_v26 = vpop.eup %1580  ;;  %v1219_v5 = vsub.f32 %v1850_v27, %v1203_v19  ;;  %v1154_v60 = vmul.f32 0.6931472, %v1579_v32 }
 0x4f5   :  { %v1020_v28 = vpop.xlane.xlu1 %1019  ;;  %v1124_v0 = vmul.f32 0.6931472, %v1581_v26 }
 0x4f6   :  { %v1235_v6 = vsel %vm1801_vm2, %v1219_v5, 0.0  ;;  %v1184_v40 = vadd.f32 %v1154_v60, %v2047_v43  ;;  %1594 = vlog2.f32 %v1020_v28 }
 0x4f7   :  { %v1583_v8 = vpop.eup %1582  ;;  %1251 = vst.msk [vmem:[%s2452_s6 + $0x20] sm:$0xff] %vm429_vm1, %v1235_v6  ;;  %v1145_v44 = vadd.f32 %v1124_v0, %v2084_v18 }
 0x4f8   :  { %v1585_v7 = vpop.eup %1584  ;;  %v1200_v27 = vsel %vm737_vm3, %v1136_v49, %v1184_v40  ;;  %v1162_v58 = vmul.f32 0.6931472, %v1583_v8 }
 0x4f9   :  { %v1216_v55 = vsub.f32 %v1874_v42, %v1200_v27  ;;  %v1172_v13 = vmul.f32 0.6931472, %v1585_v7  ;;  %v1084_v1 = vpop.xlane.xlu1 %1083 }
 0x4fa   :  { %v1188_v43 = vadd.f32 %v1162_v58, %v2061_v57  ;;  %1596 = vlog2.f32 %v1084_v1 }
 0x4fb   :  { %v1587_v25 = vpop.eup %1586  ;;  %v1232_v54 = vsel %vm1801_vm2, %v1216_v55, 0.0  ;;  %v1193_v46 = vadd.f32 %v1172_v13, %v2096_v39 }
 0x4fc   :  { %v1589_v24 = vpop.eup %1588  ;;  %1248 = vst.msk [vmem:[%s2452_s6 + $0x8] sm:$0xff] %vm429_vm1, %v1232_v54  ;;  %v1204_v42 = vsel %vm737_vm3, %v1140_v12, %v1188_v43  ;;  %v1126_v2 = vmul.f32 0.6931472, %v1587_v25 }
 0x4fd   :  { %v1220_v33 = vsub.f32 %v1862_v34, %v1204_v42  ;;  %v1209_v57 = vsel %vm737_vm3, %v1145_v44, %v1193_v46  ;;  %v1038_v41 = vpop.xlane.xlu1 %1037  ;;  %v1035_v48 = vpop.xlane.xlu0 %1034  ;;  %v1120_v53 = vmul.f32 0.6931472, %v1589_v24 }
 0x4fe   :  { %v1225_v18 = vsub.f32 %v1895_v17, %v1209_v57  ;;  %v1146_v52 = vadd.f32 %v1126_v2, %v2082_v16 }
 0x4ff   :  { %v1591_v39 = vpop.eup %1590  ;;  %v1236_v14 = vsel %vm1801_vm2, %v1220_v33, 0.0  ;;  %v1143_v50 = vadd.f32 %v1120_v53, %v2118_v63 }
 0x500   :  { %v1593_v21 = vpop.eup %1592  ;;  %1252 = vst.msk [vmem:[%s2452_s6 + $0x28] sm:$0xff] %vm429_vm1, %v1236_v14  ;;  %v1241_v34 = vsel %vm1801_vm2, %v1225_v18, 0.0  ;;  %v1174_v35 = vmul.f32 0.6931472, %v1591_v39  ;;  %v2463_v14 = vld [vmem:[#allocation4_spill] sm:$0xff] }
 0x501   :  { %1257 = vst.msk [vmem:[%s2452_s6 + $0x50] sm:$0xff] %vm429_vm1, %v1241_v34  ;;  %v1168_v17 = vmul.f32 0.6931472, %v1593_v21  ;;  %v1032_v4 = vpop.xlane.xlu1 %1031  ;;  %v1029_v11 = vpop.xlane.xlu0 %1028  ;;  %v2464_v21 = vld [vmem:[#allocation5_spill] sm:$0xff] }
 0x502   :  { %v1194_v31 = vadd.f32 %v1174_v35, %v2094_v38  ;;  %1598 = vlog2.f32 %v1032_v4 }
 0x503   :  { %v1595_v29 = vpop.eup %1594  ;;  %v1191_v32 = vadd.f32 %v1168_v17, %v2130_v23  ;;  %1600 = vlog2.f32 %v1029_v11  ;;  %v2466_v17 = vld [vmem:[#allocation2_spill] sm:$0xff] }
 0x504   :  { %v1210_v19 = vsel %vm737_vm3, %v1146_v52, %v1194_v31  ;;  %1602 = vlog2.f32 %v1038_v41  ;;  %v1122_v49 = vmul.f32 0.6931472, %v1595_v29 }
 0x505   :  { %v1226_v26 = vsub.f32 %v1898_v61, %v1210_v19  ;;  %v1207_v5 = vsel %vm737_vm3, %v1143_v50, %v1191_v32  ;;  %1604 = vlog2.f32 %v1035_v48  ;;  %v1096_v16 = vpop.xlane.xlu1 %1095  ;;  %v1093_v60 = vpop.xlane.xlu0 %1092 }
 0x506   :  { %v1223_v38 = vsub.f32 %v1919_v9, %v1207_v5  ;;  %1606 = vlog2.f32 %v1096_v16  ;;  %v1144_v6 = vadd.f32 %v1122_v49, %v2116_v62 }
 0x507   :  { %v1597_v63 = vpop.eup %1596  ;;  %v1242_v23 = vsel %vm1801_vm2, %v1226_v26, 0.0  ;;  %1608 = vlog2.f32 %v1093_v60 }
 0x508   :  { %1258 = vst.msk [vmem:[%s2452_s6 + $0x58] sm:$0xff] %vm429_vm1, %v1242_v23  ;;  %v1239_v61 = vsel %vm1801_vm2, %v1223_v38, 0.0  ;;  %v1170_v28 = vmul.f32 0.6931472, %v1597_v63 }
 0x509   :  { %1255 = vst.msk [vmem:[%s2452_s6 + $0x40] sm:$0xff] %vm429_vm1, %v1239_v61  ;;  %v1102_v9 = vpop.xlane.xlu1 %1101  ;;  %v1099_v20 = vpop.xlane.xlu0 %1098 }
 0x50a   :  { %v1192_v40 = vadd.f32 %v1170_v28, %v2128_v22  ;;  %1610 = vlog2.f32 %v1102_v9 }
 0x50b   :  { %1612 = vlog2.f32 %v1099_v20 }
 0x50c   :  { %v1208_v8 = vsel %vm737_vm3, %v1144_v6, %v1192_v40 }
 0x50d   :  { %v1224_v0 = vsub.f32 %v1922_v10, %v1208_v8 }
 0x50f   :  { %v1599_v7 = vpop.eup %1598  ;;  %v1240_v27 = vsel %vm1801_vm2, %v1224_v0, 0.0 }
 0x510   :  { %v1601_v58 = vpop.eup %1600  ;;  %1256 = vst.msk [vmem:[%s2452_s6 + $0x48] sm:$0xff] %vm429_vm1, %v1240_v27  ;;  %v1130_v22 = vmul.f32 0.6931472, %v1599_v7 }
 0x511   :  { %v1603_v62 = vpop.eup %1602  ;;  %v1128_v1 = vmul.f32 0.6931472, %v1601_v58 }
 0x512   :  { %v1605_v55 = vpop.eup %1604  ;;  %v1134_v54 = vmul.f32 0.6931472, %v1603_v62  ;;  %v1148_v10 = vadd.f32 %v1130_v22, %v2164_v15 }
 0x513   :  { %v1607_v13 = vpop.eup %1606  ;;  %v1132_v24 = vmul.f32 0.6931472, %v1605_v55  ;;  %v1147_v42 = vadd.f32 %v1128_v1, %v2166_v30 }
 0x514   :  { %v1609_v12 = vpop.eup %1608  ;;  %v1178_v43 = vmul.f32 0.6931472, %v1607_v13  ;;  %v1150_v15 = vadd.f32 %v1134_v54, %v2150_v56  ;;  %v2465_v56 = vld [vmem:[#allocation3_spill] sm:$0xff] }
 0x515   :  { %v1176_v25 = vmul.f32 0.6931472, %v1609_v12  ;;  %v1149_v30 = vadd.f32 %v1132_v24, %v2152_v59 }
 0x516   :  { %v1196_v44 = vadd.f32 %v1178_v43, %v2172_v45 }
 0x517   :  { %v1611_v46 = vpop.eup %1610  ;;  %v1195_v33 = vadd.f32 %v1176_v25, %v2174_v51 }
 0x518   :  { %v1613_v57 = vpop.eup %1612  ;;  %v1212_v41 = vsel %vm737_vm3, %v1148_v10, %v1196_v44  ;;  %v1182_v48 = vmul.f32 0.6931472, %v1611_v46 }
 0x519   :  { %v1228_v18 = vsub.f32 %v1958_v37, %v1212_v41  ;;  %v1211_v2 = vsel %vm737_vm3, %v1147_v42, %v1195_v33  ;;  %v1180_v39 = vmul.f32 0.6931472, %v1613_v57 }
 0x51a   :  { %v1227_v45 = vsub.f32 %v1955_v36, %v1211_v2  ;;  %v1198_v53 = vadd.f32 %v1182_v48, %v2463_v14 }
 0x51b   :  { %v1244_v51 = vsel %vm1801_vm2, %v1228_v18, 0.0  ;;  %v1197_v34 = vadd.f32 %v1180_v39, %v2464_v21 }
 0x51c   :  { %1260 = vst.msk [vmem:[%s2452_s6 + $0x68] sm:$0xff] %vm429_vm1, %v1244_v51  ;;  %v1243_v37 = vsel %vm1801_vm2, %v1227_v45, 0.0  ;;  %v1214_v36 = vsel %vm737_vm3, %v1150_v15, %v1198_v53 }
 0x51d   :  { %1259 = vst.msk [vmem:[%s2452_s6 + $0x60] sm:$0xff] %vm429_vm1, %v1243_v37  ;;  %v1230_v59 = vsub.f32 %v2465_v56, %v1214_v36  ;;  %v1213_v35 = vsel %vm737_vm3, %v1149_v30, %v1197_v34 }
 0x51e   :  { %v1229_v4 = vsub.f32 %v2466_v17, %v1213_v35 }
 0x51f   :  { %v1246_v11 = vsel %vm1801_vm2, %v1230_v59, 0.0 }
 0x520   :  { %1262 = vst.msk [vmem:[%s2452_s6 + $0x78] sm:$0xff] %vm429_vm1, %v1246_v11  ;;  %v1245_v52 = vsel %vm1801_vm2, %v1229_v4, 0.0 }
 0x521   :  { %1261 = vst.msk [vmem:[%s2452_s6 + $0x70] sm:$0xff] %vm429_vm1, %v1245_v52 }

</bundles_post_ra>
